<compile_context>
chip_gen: v5e
topology: v5e:2x2
jax: 0.10.0
libtpu: 0.0.40
codegen_flags: <defaults>
</compile_context>

<pallas_src>
import math

import jax
import jax.numpy as jnp
from jax.experimental import pallas as pl
from jax.experimental.pallas import tpu as pltpu

OUT_LANES = 128  # lane-dense output slab width


# ---------------------------------------------------------------------------
# Host-side packing: everything into one lane-padded (R, 128) f32 buffer
# ---------------------------------------------------------------------------
def pack_params(params, key_size):
    """Returns (block_cfgs, layouts, wbuf).

    layouts holds (row_offset, rows, cols) for each parameter slice inside the
    single packed buffer.  Each parameter starts at a sublane-aligned row
    (multiple of 8) and lane 0, so in-kernel loads are aligned.
    """
    chunks = []
    layouts = []
    cfgs = []
    cursor = 0
    scale = 1.0 / math.sqrt(key_size)

    def add(a):
        nonlocal cursor
        a = jnp.asarray(a, jnp.float32)
        r, c = a.shape
        rpad = ((r + 7) // 8) * 8
        buf = jnp.zeros((rpad, OUT_LANES), jnp.float32).at[:r, :c].set(a)
        chunks.append(buf)
        slot = (cursor, r, c)
        cursor += rpad
        return slot

    for blk in params["blocks"]:
        wq, bq, wk, bk, wv, bv = blk["attn"]
        # Fold the 1/sqrt(key_size) attention scale into the Q projection.
        wqkv = jnp.concatenate([wq * scale, wk, wv], axis=1)
        bqkv = jnp.concatenate([bq * scale, bk, bv], axis=1)
        lay = {"wqkv": add(wqkv), "bqkv": add(bqkv), "convs": []}

        ks = blk["convs"][0][0].shape[0]
        for (cw, cb) in blk["convs"]:
            k_, ci, co = cw.shape
            # im2col weight: (ks, ci, cout) -> (ks*ci, cout)
            lay["convs"].append((add(cw.reshape(k_ * ci, co)), add(cb)))

        if blk["downsample"] is not None:
            wd, bd = blk["downsample"]
            lay["downsample"] = (add(wd), add(2.0 * bd))   # pre-doubled bias
        else:
            lay["downsample"] = None

        layouts.append(lay)
        cfgs.append(dict(
            cin=wq.shape[0],
            cout=blk["convs"][-1][0].shape[2],
            ksize=ks,
            dilation=blk["dilation"],
            nsub=len(blk["convs"]),
            has_downsample=blk["downsample"] is not None))

    wbuf = jnp.concatenate(chunks, axis=0)
    return cfgs, layouts, wbuf


# ---------------------------------------------------------------------------
# Fused kernel: the whole TemporalConvNet, both batch elements, one grid step
# ---------------------------------------------------------------------------
def make_tcn_kernel(block_cfgs, layouts, key_size, T, B, C_last):
    def kernel(x_ref, w_ref, out_ref):
        # ---- hoisted loop invariants (JAX does not CSE broadcast_in_dim) ----
        row = jax.lax.broadcasted_iota(jnp.int32, (T, T), 0)   # query index j
        col = jax.lax.broadcasted_iota(jnp.int32, (T, T), 1)   # key   index i
        causal = col > row                                     # future keys masked
        tvec = jax.lax.broadcasted_iota(jnp.int32, (T, 1), 0)  # time index

        def ld(slot):
            off, r, c = slot
            return w_ref[off:off + r, 0:c]

        for b in range(B):                         # B=2, unrolled: ILP on 1 TC
            h = x_ref[b]                           # (T, C0) time-major

            for cfg, lay in zip(block_cfgs, layouts):
                cin, cout = cfg["cin"], cfg["cout"]
                ks, dil = cfg["ksize"], cfg["dilation"]

                # ---- AttentionBlock: fused (pre-scaled) Q|K|V projection ----
                wqkv = ld(lay["wqkv"])
                bqkv = ld(lay["bqkv"])
                qkv = jnp.dot(h, wqkv, preferred_element_type=jnp.float32) + bqkv
                q = qkv[:, :key_size]              # already scaled by 1/sqrt(ks)
                k = qkv[:, key_size:2 * key_size]
                v = qkv[:, 2 * key_size:]

                s = jnp.dot(q, k.T, preferred_element_type=jnp.float32)  # (Tq,Tk)
                s = jnp.where(causal, -jnp.inf, s)
                # softmax over the *query* axis (dim=1 in the PyTorch code)
                m = jnp.max(s, axis=0, keepdims=True)
                e = jnp.exp(s - m)
                w = e * pl.reciprocal(jnp.sum(e, axis=0, keepdims=True),
                                      approx=True)                       # weight_temp
                attn = jnp.dot(w, v, preferred_element_type=jnp.float32)  # (T, cin)

                # weight_x = softmax(weight_temp.sum(over keys), over queries)
                srow = jnp.sum(w, axis=1, keepdims=True)                 # (T, 1)
                e2 = jnp.exp(srow - jnp.max(srow, axis=0, keepdims=True))
                wx = e2 * pl.reciprocal(jnp.sum(e2, axis=0, keepdims=True),
                                        approx=True)                     # (T, 1)

                # ---- causal dilated convs: Conv1d + Chomp1d + ReLU --------
                # Register-resident causal shifts (XLU roll + VPU select),
                # im2col lane-concat, then ONE MXU dot per sub-block.
                g = attn
                pad = (ks - 1) * dil
                for si, (wslot, bslot) in enumerate(lay["convs"]):
                    taps = []
                    for kk in range(ks):
                        shift = pad - kk * dil
                        if shift == 0:
                            taps.append(g)
                        else:
                            rolled = pltpu.roll(g, shift=shift, axis=0)
                            taps.append(jnp.where(tvec < shift, 0.0, rolled))
                    tapmat = jnp.concatenate(taps, axis=-1)       # (T, ks*ci)
                    g = jnp.maximum(
                        jnp.dot(tapmat, ld(wslot),
                                preferred_element_type=jnp.float32) + ld(bslot),
                        0.0)
                    # TODO(synk): nn.Dropout is identity at inference;
                    # training-mode dropout / weight_norm reparam not modeled.

                # ---- residual + en_res combine (downsample dots folded) ----
                scaled = h * (1.0 + wx)            # x + weight_x * x
                if cfg["has_downsample"]:
                    wd = ld(lay["downsample"][0])
                    bd2 = ld(lay["downsample"][1])  # already 2*bd
                    resen = jnp.dot(scaled, wd,
                                    preferred_element_type=jnp.float32) + bd2
                else:
                    resen = scaled
                h = jnp.maximum(g + resen, 0.0)    # relu(out + res + en_res_x)

            # ---- lane-dense output store (unmasked full-lane vst) ----------
            hp = jnp.concatenate(
                [h, jnp.zeros((T, OUT_LANES - C_last), jnp.float32)], axis=-1)
            out_ref[b] = hp

    return kernel


# ---------------------------------------------------------------------------
# Host-side wrapper: whole net = one pallas_call (no grid)
# ---------------------------------------------------------------------------
def temporal_conv_net_forward(x_ncl, block_cfgs, layouts, wbuf, key_size):
    """x_ncl: (B, C, T) like PyTorch Conv1d input."""
    B, C0, T = x_ncl.shape
    C_last = block_cfgs[-1]["cout"]
    x_t = jnp.transpose(x_ncl, (0, 2, 1))              # (B, T, C) time-major

    kernel = make_tcn_kernel(block_cfgs, layouts, key_size, T, B, C_last)
    out_padded = pl.pallas_call(
        kernel,
        out_shape=jax.ShapeDtypeStruct((B, T, OUT_LANES), jnp.float32),
        in_specs=[pl.BlockSpec(memory_space=pltpu.MemorySpace.VMEM),
                  pl.BlockSpec(memory_space=pltpu.MemorySpace.VMEM)],
        out_specs=pl.BlockSpec(memory_space=pltpu.MemorySpace.VMEM),
    )(x_t, wbuf)

    out_t = out_padded[:, :, :C_last]                   # drop lane padding
    attn_weight_list = [[0, 0] for _ in block_cfgs]     # visual=False placeholder
    return jnp.transpose(out_t, (0, 2, 1)), attn_weight_list


# ---------------------------------------------------------------------------
# Pure-JAX reference (mirrors the PyTorch math exactly) for verification
# ---------------------------------------------------------------------------
def ref_forward(x_ncl, params, key_size):
    x_t = jnp.transpose(x_ncl, (0, 2, 1))
    out = x_t
    for blk in params["blocks"]:
        wq, bq, wk, bk, wv, bv = blk["attn"]
        q = out @ wq + bq
        k = out @ wk + bk
        v = out @ wv + bv
        s = jnp.einsum("btk,bsk->bts", q, k)
        T = out.shape[1]
        mask = jnp.arange(T)[None, :] > jnp.arange(T)[:, None]
        s = jnp.where(mask[None], -jnp.inf, s) / math.sqrt(key_size)
        w = jax.nn.softmax(s, axis=1)
        attn_out = jnp.einsum("bts,bsc->btc", w, v)
        wx = jax.nn.softmax(jnp.sum(w, axis=2), axis=1)[..., None]
        h = attn_out
        for (cw, cb) in blk["convs"]:
            K = cw.shape[0]
            d = blk["dilation"]
            pad = (K - 1) * d
            xp = jnp.pad(h, ((0, 0), (pad, 0), (0, 0)))
            acc = sum(xp[:, i * d:i * d + T, :] @ cw[i] for i in range(K)) + cb
            h = jax.nn.relu(acc)
        if blk["downsample"] is not None:
            wd, bd = blk["downsample"]
            res = out @ wd + bd
            en = (wx * out) @ wd + bd
        else:
            res = out
            en = wx * out
        out = jax.nn.relu(h + res + en)
    return jnp.transpose(out, (0, 2, 1))


# ---------------------------------------------------------------------------
# Deterministic parameter construction
# ---------------------------------------------------------------------------
def init_params(key, emb_size, num_channels, kernel_size, key_size, num_sub_blocks):
    blocks = []
    for i, c_out in enumerate(num_channels):
        c_in = emb_size if i == 0 else num_channels[i - 1]
        keys = jax.random.split(jax.random.fold_in(key, i), 12)
        lin = 1.0 / math.sqrt(c_in)
        attn = (
            jax.random.uniform(keys[0], (c_in, key_size), jnp.float32, -lin, lin),
            jax.random.uniform(keys[1], (1, key_size), jnp.float32, -lin, lin),
            jax.random.uniform(keys[2], (c_in, key_size), jnp.float32, -lin, lin),
            jax.random.uniform(keys[3], (1, key_size), jnp.float32, -lin, lin),
            jax.random.uniform(keys[4], (c_in, c_in), jnp.float32, -lin, lin),
            jax.random.uniform(keys[5], (1, c_in), jnp.float32, -lin, lin),
        )
        convs = []
        for s in range(num_sub_blocks):
            ci = c_in if s == 0 else c_out
            w = 0.01 * jax.random.normal(keys[6 + s], (kernel_size, ci, c_out), jnp.float32)
            bb = 1.0 / math.sqrt(ci * kernel_size)
            b = jax.random.uniform(keys[8 + s], (1, c_out), jnp.float32, -bb, bb)
            convs.append((w, b))
        if c_in != c_out:
            wd = 0.01 * jax.random.normal(keys[10], (c_in, c_out), jnp.float32)
            bd = jax.random.uniform(keys[11], (1, c_out), jnp.float32,
                                    -1.0 / math.sqrt(c_in), 1.0 / math.sqrt(c_in))
            downsample = (wd, bd)
        else:
            downsample = None
        blocks.append({"attn": attn, "convs": convs,
                       "downsample": downsample, "dilation": 2 ** i})
    return {"blocks": blocks}


# ---------------------------------------------------------------------------
if __name__ == "__main__":
    B, T = 2, 16
    emb_size = 6
    num_channels = [8, 10]
    kernel_size = 3
    key_size = 4
    num_sub_blocks = 2

    root = jax.random.PRNGKey(0)
    kx, kp = jax.random.split(root)
    x = jax.random.normal(kx, (B, emb_size, T), jnp.float32)   # NCL like PyTorch
    params = init_params(kp, emb_size, num_channels, kernel_size, key_size,
                         num_sub_blocks)

    block_cfgs, layouts, wbuf = pack_params(params, key_size)

    # Single fused pallas_call (plus the two tiny NCL<->NTC transposes and the
    # lane-padding slice), compiled as one XLA program.
    fwd = jax.jit(
        lambda xv, wv: temporal_conv_net_forward(xv, block_cfgs, layouts, wv,
                                                 key_size)[0])
    out = jax.block_until_ready(fwd(x, wbuf))

    ref = jax.block_until_ready(ref_forward(x, params, key_size))
    assert out.shape == (B, num_channels[-1], T), out.shape
    assert jnp.allclose(out, ref, rtol=1e-3, atol=1e-4), \
        float(jnp.max(jnp.abs(out - ref)))

    print("KERNEL_OK")
</pallas_src>

<mosaic_0001>
module attributes {stable_mosaic.version = 11 : i64} {
  func.func @kernel(%arg0: memref<2x16x6xf32, #tpu.memory_space<vmem>>, %arg1: memref<200x128xf32, #tpu.memory_space<vmem>>, %arg2: memref<2x16x128xf32, #tpu.memory_space<vmem>>) attributes {dimension_semantics = [], scalar_prefetch = 0 : i64, scratch_operands = 0 : i64, tpu.core_type = #tpu.core_type<tc>} {
    %0 = tpu.iota {dimensions = array<i32: 0>} : vector<16x16xi32>
    %1 = tpu.iota {dimensions = array<i32: 1>} : vector<16x16xi32>
    %2 = arith.cmpi sgt, %1, %0 : vector<16x16xi32>
    %3 = tpu.iota {dimensions = array<i32: 0>} : vector<16x1xi32>
    %c0 = arith.constant 0 : index
    %c0_0 = arith.constant 0 : index
    %c0_1 = arith.constant 0 : index
    %4 = vector.load %arg0[%c0, %c0_0, %c0_1] : memref<2x16x6xf32, #tpu.memory_space<vmem>>, vector<1x16x6xf32>
    %5 = vector.shape_cast %4 : vector<1x16x6xf32> to vector<16x6xf32>
    %c0_2 = arith.constant 0 : index
    %c0_3 = arith.constant 0 : index
    %6 = vector.load %arg1[%c0_2, %c0_3] : memref<200x128xf32, #tpu.memory_space<vmem>>, vector<6x14xf32>
    %c8 = arith.constant 8 : index
    %c0_4 = arith.constant 0 : index
    %7 = vector.load %arg1[%c8, %c0_4] : memref<200x128xf32, #tpu.memory_space<vmem>>, vector<1x14xf32>
    %cst = arith.constant dense<0.000000e+00> : vector<16x14xf32>
    %8 = tpu.matmul %5, %6, %cst {dimension_numbers = #tpu.dot_dimension_numbers<[1], [0], [0], [1], [0, 0, 1, 1], [], []>} : vector<16x6xf32>, vector<6x14xf32>, vector<16x14xf32> -> vector<16x14xf32>
    %9 = vector.broadcast %7 : vector<1x14xf32> to vector<16x14xf32>
    %10 = arith.addf %8, %9 : vector<16x14xf32>
    %11 = vector.extract_strided_slice %10 {offsets = [0, 0], sizes = [16, 4], strides = [1, 1]} : vector<16x14xf32> to vector<16x4xf32>
    %12 = vector.extract_strided_slice %10 {offsets = [0, 4], sizes = [16, 4], strides = [1, 1]} : vector<16x14xf32> to vector<16x4xf32>
    %13 = vector.extract_strided_slice %10 {offsets = [0, 8], sizes = [16, 6], strides = [1, 1]} : vector<16x14xf32> to vector<16x6xf32>
    %14 = tpu.transpose %12, [1, 0] : vector<16x4xf32> -> vector<4x16xf32>
    %cst_5 = arith.constant dense<0.000000e+00> : vector<16x16xf32>
    %15 = tpu.matmul %11, %14, %cst_5 {dimension_numbers = #tpu.dot_dimension_numbers<[1], [0], [0], [1], [0, 0, 1, 1], [], []>} : vector<16x4xf32>, vector<4x16xf32>, vector<16x16xf32> -> vector<16x16xf32>
    %cst_6 = arith.constant 0xFF800000 : f32
    %16 = vector.broadcast %cst_6 : f32 to vector<16x16xf32>
    %17 = arith.select %2, %16, %15 : vector<16x16xi1>, vector<16x16xf32>
    %cst_7 = arith.constant dense<0xFF800000> : vector<16xf32>
    %18 = vector.multi_reduction <maximumf>, %17, %cst_7 [0] : vector<16x16xf32> to vector<16xf32>
    %19 = vector.shape_cast %18 : vector<16xf32> to vector<1x16xf32>
    %20 = vector.broadcast %19 : vector<1x16xf32> to vector<16x16xf32>
    %21 = arith.subf %17, %20 : vector<16x16xf32>
    %22 = math.exp %21 : vector<16x16xf32>
    %cst_8 = arith.constant dense<0.000000e+00> : vector<16xf32>
    %23 = vector.multi_reduction <add>, %22, %cst_8 [0] : vector<16x16xf32> to vector<16xf32>
    %24 = vector.shape_cast %23 : vector<16xf32> to vector<1x16xf32>
    %25 = tpu.reciprocal %24 {approx = true} : vector<1x16xf32> -> vector<1x16xf32>
    %26 = vector.broadcast %25 : vector<1x16xf32> to vector<16x16xf32>
    %27 = arith.mulf %22, %26 : vector<16x16xf32>
    %cst_9 = arith.constant dense<0.000000e+00> : vector<16x6xf32>
    %28 = tpu.matmul %27, %13, %cst_9 {dimension_numbers = #tpu.dot_dimension_numbers<[1], [0], [0], [1], [0, 0, 1, 1], [], []>} : vector<16x16xf32>, vector<16x6xf32>, vector<16x6xf32> -> vector<16x6xf32>
    %cst_10 = arith.constant dense<0.000000e+00> : vector<16xf32>
    %29 = vector.multi_reduction <add>, %27, %cst_10 [1] : vector<16x16xf32> to vector<16xf32>
    %30 = vector.shape_cast %29 : vector<16xf32> to vector<16x1xf32>
    %cst_11 = arith.constant dense<0xFF800000> : vector<1xf32>
    %31 = vector.multi_reduction <maximumf>, %30, %cst_11 [0] : vector<16x1xf32> to vector<1xf32>
    %32 = vector.shape_cast %31 : vector<1xf32> to vector<1x1xf32>
    %33 = vector.broadcast %32 : vector<1x1xf32> to vector<16x1xf32>
    %34 = arith.subf %30, %33 : vector<16x1xf32>
    %35 = math.exp %34 : vector<16x1xf32>
    %cst_12 = arith.constant dense<0.000000e+00> : vector<1xf32>
    %36 = vector.multi_reduction <add>, %35, %cst_12 [0] : vector<16x1xf32> to vector<1xf32>
    %37 = vector.shape_cast %36 : vector<1xf32> to vector<1x1xf32>
    %38 = tpu.reciprocal %37 {approx = true} : vector<1x1xf32> -> vector<1x1xf32>
    %39 = vector.broadcast %38 : vector<1x1xf32> to vector<16x1xf32>
    %40 = arith.mulf %35, %39 : vector<16x1xf32>
    %c2_i32 = arith.constant 2 : i32
    %41 = tpu.dynamic_rotate %28 by %c2_i32 dim 0 : vector<16x6xf32>, i32 -> vector<16x6xf32>
    %c2_i32_13 = arith.constant 2 : i32
    %42 = vector.broadcast %c2_i32_13 : i32 to vector<16x1xi32>
    %43 = arith.cmpi slt, %3, %42 : vector<16x1xi32>
    %cst_14 = arith.constant 0.000000e+00 : f32
    %44 = vector.shape_cast %43 : vector<16x1xi1> to vector<16x1xi1>
    %45 = vector.broadcast %44 : vector<16x1xi1> to vector<16x6xi1>
    %46 = vector.broadcast %cst_14 : f32 to vector<16x6xf32>
    %47 = arith.select %45, %46, %41 : vector<16x6xi1>, vector<16x6xf32>
    %c1_i32 = arith.constant 1 : i32
    %48 = tpu.dynamic_rotate %28 by %c1_i32 dim 0 : vector<16x6xf32>, i32 -> vector<16x6xf32>
    %c1_i32_15 = arith.constant 1 : i32
    %49 = vector.broadcast %c1_i32_15 : i32 to vector<16x1xi32>
    %50 = arith.cmpi slt, %3, %49 : vector<16x1xi32>
    %cst_16 = arith.constant 0.000000e+00 : f32
    %51 = vector.shape_cast %50 : vector<16x1xi1> to vector<16x1xi1>
    %52 = vector.broadcast %51 : vector<16x1xi1> to vector<16x6xi1>
    %53 = vector.broadcast %cst_16 : f32 to vector<16x6xf32>
    %54 = arith.select %52, %53, %48 : vector<16x6xi1>, vector<16x6xf32>
    %55 = tpu.concatenate %47, %54, %28 in 1 : vector<16x6xf32>, vector<16x6xf32>, vector<16x6xf32> -> vector<16x18xf32>
    %c16 = arith.constant 16 : index
    %c0_17 = arith.constant 0 : index
    %56 = vector.load %arg1[%c16, %c0_17] : memref<200x128xf32, #tpu.memory_space<vmem>>, vector<18x8xf32>
    %cst_18 = arith.constant dense<0.000000e+00> : vector<16x8xf32>
    %57 = tpu.matmul %55, %56, %cst_18 {dimension_numbers = #tpu.dot_dimension_numbers<[1], [0], [0], [1], [0, 0, 1, 1], [], []>} : vector<16x18xf32>, vector<18x8xf32>, vector<16x8xf32> -> vector<16x8xf32>
    %c40 = arith.constant 40 : index
    %c0_19 = arith.constant 0 : index
    %58 = vector.load %arg1[%c40, %c0_19] : memref<200x128xf32, #tpu.memory_space<vmem>>, vector<1x8xf32>
    %59 = vector.broadcast %58 : vector<1x8xf32> to vector<16x8xf32>
    %60 = arith.addf %57, %59 : vector<16x8xf32>
    %cst_20 = arith.constant 0.000000e+00 : f32
    %61 = vector.broadcast %cst_20 : f32 to vector<16x8xf32>
    %62 = arith.maximumf %60, %61 : vector<16x8xf32>
    %c2_i32_21 = arith.constant 2 : i32
    %63 = tpu.dynamic_rotate %62 by %c2_i32_21 dim 0 : vector<16x8xf32>, i32 -> vector<16x8xf32>
    %c2_i32_22 = arith.constant 2 : i32
    %64 = vector.broadcast %c2_i32_22 : i32 to vector<16x1xi32>
    %65 = arith.cmpi slt, %3, %64 : vector<16x1xi32>
    %cst_23 = arith.constant 0.000000e+00 : f32
    %66 = vector.shape_cast %65 : vector<16x1xi1> to vector<16x1xi1>
    %67 = vector.broadcast %66 : vector<16x1xi1> to vector<16x8xi1>
    %68 = vector.broadcast %cst_23 : f32 to vector<16x8xf32>
    %69 = arith.select %67, %68, %63 : vector<16x8xi1>, vector<16x8xf32>
    %c1_i32_24 = arith.constant 1 : i32
    %70 = tpu.dynamic_rotate %62 by %c1_i32_24 dim 0 : vector<16x8xf32>, i32 -> vector<16x8xf32>
    %c1_i32_25 = arith.constant 1 : i32
    %71 = vector.broadcast %c1_i32_25 : i32 to vector<16x1xi32>
    %72 = arith.cmpi slt, %3, %71 : vector<16x1xi32>
    %cst_26 = arith.constant 0.000000e+00 : f32
    %73 = vector.shape_cast %72 : vector<16x1xi1> to vector<16x1xi1>
    %74 = vector.broadcast %73 : vector<16x1xi1> to vector<16x8xi1>
    %75 = vector.broadcast %cst_26 : f32 to vector<16x8xf32>
    %76 = arith.select %74, %75, %70 : vector<16x8xi1>, vector<16x8xf32>
    %77 = tpu.concatenate %69, %76, %62 in 1 : vector<16x8xf32>, vector<16x8xf32>, vector<16x8xf32> -> vector<16x24xf32>
    %c48 = arith.constant 48 : index
    %c0_27 = arith.constant 0 : index
    %78 = vector.load %arg1[%c48, %c0_27] : memref<200x128xf32, #tpu.memory_space<vmem>>, vector<24x8xf32>
    %cst_28 = arith.constant dense<0.000000e+00> : vector<16x8xf32>
    %79 = tpu.matmul %77, %78, %cst_28 {dimension_numbers = #tpu.dot_dimension_numbers<[1], [0], [0], [1], [0, 0, 1, 1], [], []>} : vector<16x24xf32>, vector<24x8xf32>, vector<16x8xf32> -> vector<16x8xf32>
    %c72 = arith.constant 72 : index
    %c0_29 = arith.constant 0 : index
    %80 = vector.load %arg1[%c72, %c0_29] : memref<200x128xf32, #tpu.memory_space<vmem>>, vector<1x8xf32>
    %81 = vector.broadcast %80 : vector<1x8xf32> to vector<16x8xf32>
    %82 = arith.addf %79, %81 : vector<16x8xf32>
    %cst_30 = arith.constant 0.000000e+00 : f32
    %83 = vector.broadcast %cst_30 : f32 to vector<16x8xf32>
    %84 = arith.maximumf %82, %83 : vector<16x8xf32>
    %cst_31 = arith.constant 1.000000e+00 : f32
    %85 = vector.broadcast %cst_31 : f32 to vector<16x1xf32>
    %86 = arith.addf %85, %40 : vector<16x1xf32>
    %87 = vector.broadcast %86 : vector<16x1xf32> to vector<16x6xf32>
    %88 = arith.mulf %5, %87 : vector<16x6xf32>
    %c80 = arith.constant 80 : index
    %c0_32 = arith.constant 0 : index
    %89 = vector.load %arg1[%c80, %c0_32] : memref<200x128xf32, #tpu.memory_space<vmem>>, vector<6x8xf32>
    %c88 = arith.constant 88 : index
    %c0_33 = arith.constant 0 : index
    %90 = vector.load %arg1[%c88, %c0_33] : memref<200x128xf32, #tpu.memory_space<vmem>>, vector<1x8xf32>
    %cst_34 = arith.constant dense<0.000000e+00> : vector<16x8xf32>
    %91 = tpu.matmul %88, %89, %cst_34 {dimension_numbers = #tpu.dot_dimension_numbers<[1], [0], [0], [1], [0, 0, 1, 1], [], []>} : vector<16x6xf32>, vector<6x8xf32>, vector<16x8xf32> -> vector<16x8xf32>
    %92 = vector.broadcast %90 : vector<1x8xf32> to vector<16x8xf32>
    %93 = arith.addf %91, %92 : vector<16x8xf32>
    %94 = arith.addf %84, %93 : vector<16x8xf32>
    %cst_35 = arith.constant 0.000000e+00 : f32
    %95 = vector.broadcast %cst_35 : f32 to vector<16x8xf32>
    %96 = arith.maximumf %94, %95 : vector<16x8xf32>
    %c96 = arith.constant 96 : index
    %c0_36 = arith.constant 0 : index
    %97 = vector.load %arg1[%c96, %c0_36] : memref<200x128xf32, #tpu.memory_space<vmem>>, vector<8x16xf32>
    %c104 = arith.constant 104 : index
    %c0_37 = arith.constant 0 : index
    %98 = vector.load %arg1[%c104, %c0_37] : memref<200x128xf32, #tpu.memory_space<vmem>>, vector<1x16xf32>
    %cst_38 = arith.constant dense<0.000000e+00> : vector<16x16xf32>
    %99 = tpu.matmul %96, %97, %cst_38 {dimension_numbers = #tpu.dot_dimension_numbers<[1], [0], [0], [1], [0, 0, 1, 1], [], []>} : vector<16x8xf32>, vector<8x16xf32>, vector<16x16xf32> -> vector<16x16xf32>
    %100 = vector.broadcast %98 : vector<1x16xf32> to vector<16x16xf32>
    %101 = arith.addf %99, %100 : vector<16x16xf32>
    %102 = vector.extract_strided_slice %101 {offsets = [0, 0], sizes = [16, 4], strides = [1, 1]} : vector<16x16xf32> to vector<16x4xf32>
    %103 = vector.extract_strided_slice %101 {offsets = [0, 4], sizes = [16, 4], strides = [1, 1]} : vector<16x16xf32> to vector<16x4xf32>
    %104 = vector.extract_strided_slice %101 {offsets = [0, 8], sizes = [16, 8], strides = [1, 1]} : vector<16x16xf32> to vector<16x8xf32>
    %105 = tpu.transpose %103, [1, 0] : vector<16x4xf32> -> vector<4x16xf32>
    %cst_39 = arith.constant dense<0.000000e+00> : vector<16x16xf32>
    %106 = tpu.matmul %102, %105, %cst_39 {dimension_numbers = #tpu.dot_dimension_numbers<[1], [0], [0], [1], [0, 0, 1, 1], [], []>} : vector<16x4xf32>, vector<4x16xf32>, vector<16x16xf32> -> vector<16x16xf32>
    %cst_40 = arith.constant 0xFF800000 : f32
    %107 = vector.broadcast %cst_40 : f32 to vector<16x16xf32>
    %108 = arith.select %2, %107, %106 : vector<16x16xi1>, vector<16x16xf32>
    %cst_41 = arith.constant dense<0xFF800000> : vector<16xf32>
    %109 = vector.multi_reduction <maximumf>, %108, %cst_41 [0] : vector<16x16xf32> to vector<16xf32>
    %110 = vector.shape_cast %109 : vector<16xf32> to vector<1x16xf32>
    %111 = vector.broadcast %110 : vector<1x16xf32> to vector<16x16xf32>
    %112 = arith.subf %108, %111 : vector<16x16xf32>
    %113 = math.exp %112 : vector<16x16xf32>
    %cst_42 = arith.constant dense<0.000000e+00> : vector<16xf32>
    %114 = vector.multi_reduction <add>, %113, %cst_42 [0] : vector<16x16xf32> to vector<16xf32>
    %115 = vector.shape_cast %114 : vector<16xf32> to vector<1x16xf32>
    %116 = tpu.reciprocal %115 {approx = true} : vector<1x16xf32> -> vector<1x16xf32>
    %117 = vector.broadcast %116 : vector<1x16xf32> to vector<16x16xf32>
    %118 = arith.mulf %113, %117 : vector<16x16xf32>
    %cst_43 = arith.constant dense<0.000000e+00> : vector<16x8xf32>
    %119 = tpu.matmul %118, %104, %cst_43 {dimension_numbers = #tpu.dot_dimension_numbers<[1], [0], [0], [1], [0, 0, 1, 1], [], []>} : vector<16x16xf32>, vector<16x8xf32>, vector<16x8xf32> -> vector<16x8xf32>
    %cst_44 = arith.constant dense<0.000000e+00> : vector<16xf32>
    %120 = vector.multi_reduction <add>, %118, %cst_44 [1] : vector<16x16xf32> to vector<16xf32>
    %121 = vector.shape_cast %120 : vector<16xf32> to vector<16x1xf32>
    %cst_45 = arith.constant dense<0xFF800000> : vector<1xf32>
    %122 = vector.multi_reduction <maximumf>, %121, %cst_45 [0] : vector<16x1xf32> to vector<1xf32>
    %123 = vector.shape_cast %122 : vector<1xf32> to vector<1x1xf32>
    %124 = vector.broadcast %123 : vector<1x1xf32> to vector<16x1xf32>
    %125 = arith.subf %121, %124 : vector<16x1xf32>
    %126 = math.exp %125 : vector<16x1xf32>
    %cst_46 = arith.constant dense<0.000000e+00> : vector<1xf32>
    %127 = vector.multi_reduction <add>, %126, %cst_46 [0] : vector<16x1xf32> to vector<1xf32>
    %128 = vector.shape_cast %127 : vector<1xf32> to vector<1x1xf32>
    %129 = tpu.reciprocal %128 {approx = true} : vector<1x1xf32> -> vector<1x1xf32>
    %130 = vector.broadcast %129 : vector<1x1xf32> to vector<16x1xf32>
    %131 = arith.mulf %126, %130 : vector<16x1xf32>
    %c4_i32 = arith.constant 4 : i32
    %132 = tpu.dynamic_rotate %119 by %c4_i32 dim 0 : vector<16x8xf32>, i32 -> vector<16x8xf32>
    %c4_i32_47 = arith.constant 4 : i32
    %133 = vector.broadcast %c4_i32_47 : i32 to vector<16x1xi32>
    %134 = arith.cmpi slt, %3, %133 : vector<16x1xi32>
    %cst_48 = arith.constant 0.000000e+00 : f32
    %135 = vector.shape_cast %134 : vector<16x1xi1> to vector<16x1xi1>
    %136 = vector.broadcast %135 : vector<16x1xi1> to vector<16x8xi1>
    %137 = vector.broadcast %cst_48 : f32 to vector<16x8xf32>
    %138 = arith.select %136, %137, %132 : vector<16x8xi1>, vector<16x8xf32>
    %c2_i32_49 = arith.constant 2 : i32
    %139 = tpu.dynamic_rotate %119 by %c2_i32_49 dim 0 : vector<16x8xf32>, i32 -> vector<16x8xf32>
    %c2_i32_50 = arith.constant 2 : i32
    %140 = vector.broadcast %c2_i32_50 : i32 to vector<16x1xi32>
    %141 = arith.cmpi slt, %3, %140 : vector<16x1xi32>
    %cst_51 = arith.constant 0.000000e+00 : f32
    %142 = vector.shape_cast %141 : vector<16x1xi1> to vector<16x1xi1>
    %143 = vector.broadcast %142 : vector<16x1xi1> to vector<16x8xi1>
    %144 = vector.broadcast %cst_51 : f32 to vector<16x8xf32>
    %145 = arith.select %143, %144, %139 : vector<16x8xi1>, vector<16x8xf32>
    %146 = tpu.concatenate %138, %145, %119 in 1 : vector<16x8xf32>, vector<16x8xf32>, vector<16x8xf32> -> vector<16x24xf32>
    %c112 = arith.constant 112 : index
    %c0_52 = arith.constant 0 : index
    %147 = vector.load %arg1[%c112, %c0_52] : memref<200x128xf32, #tpu.memory_space<vmem>>, vector<24x10xf32>
    %cst_53 = arith.constant dense<0.000000e+00> : vector<16x10xf32>
    %148 = tpu.matmul %146, %147, %cst_53 {dimension_numbers = #tpu.dot_dimension_numbers<[1], [0], [0], [1], [0, 0, 1, 1], [], []>} : vector<16x24xf32>, vector<24x10xf32>, vector<16x10xf32> -> vector<16x10xf32>
    %c136 = arith.constant 136 : index
    %c0_54 = arith.constant 0 : index
    %149 = vector.load %arg1[%c136, %c0_54] : memref<200x128xf32, #tpu.memory_space<vmem>>, vector<1x10xf32>
    %150 = vector.broadcast %149 : vector<1x10xf32> to vector<16x10xf32>
    %151 = arith.addf %148, %150 : vector<16x10xf32>
    %cst_55 = arith.constant 0.000000e+00 : f32
    %152 = vector.broadcast %cst_55 : f32 to vector<16x10xf32>
    %153 = arith.maximumf %151, %152 : vector<16x10xf32>
    %c4_i32_56 = arith.constant 4 : i32
    %154 = tpu.dynamic_rotate %153 by %c4_i32_56 dim 0 : vector<16x10xf32>, i32 -> vector<16x10xf32>
    %c4_i32_57 = arith.constant 4 : i32
    %155 = vector.broadcast %c4_i32_57 : i32 to vector<16x1xi32>
    %156 = arith.cmpi slt, %3, %155 : vector<16x1xi32>
    %cst_58 = arith.constant 0.000000e+00 : f32
    %157 = vector.shape_cast %156 : vector<16x1xi1> to vector<16x1xi1>
    %158 = vector.broadcast %157 : vector<16x1xi1> to vector<16x10xi1>
    %159 = vector.broadcast %cst_58 : f32 to vector<16x10xf32>
    %160 = arith.select %158, %159, %154 : vector<16x10xi1>, vector<16x10xf32>
    %c2_i32_59 = arith.constant 2 : i32
    %161 = tpu.dynamic_rotate %153 by %c2_i32_59 dim 0 : vector<16x10xf32>, i32 -> vector<16x10xf32>
    %c2_i32_60 = arith.constant 2 : i32
    %162 = vector.broadcast %c2_i32_60 : i32 to vector<16x1xi32>
    %163 = arith.cmpi slt, %3, %162 : vector<16x1xi32>
    %cst_61 = arith.constant 0.000000e+00 : f32
    %164 = vector.shape_cast %163 : vector<16x1xi1> to vector<16x1xi1>
    %165 = vector.broadcast %164 : vector<16x1xi1> to vector<16x10xi1>
    %166 = vector.broadcast %cst_61 : f32 to vector<16x10xf32>
    %167 = arith.select %165, %166, %161 : vector<16x10xi1>, vector<16x10xf32>
    %168 = tpu.concatenate %160, %167, %153 in 1 : vector<16x10xf32>, vector<16x10xf32>, vector<16x10xf32> -> vector<16x30xf32>
    %c144 = arith.constant 144 : index
    %c0_62 = arith.constant 0 : index
    %169 = vector.load %arg1[%c144, %c0_62] : memref<200x128xf32, #tpu.memory_space<vmem>>, vector<30x10xf32>
    %cst_63 = arith.constant dense<0.000000e+00> : vector<16x10xf32>
    %170 = tpu.matmul %168, %169, %cst_63 {dimension_numbers = #tpu.dot_dimension_numbers<[1], [0], [0], [1], [0, 0, 1, 1], [], []>} : vector<16x30xf32>, vector<30x10xf32>, vector<16x10xf32> -> vector<16x10xf32>
    %c176 = arith.constant 176 : index
    %c0_64 = arith.constant 0 : index
    %171 = vector.load %arg1[%c176, %c0_64] : memref<200x128xf32, #tpu.memory_space<vmem>>, vector<1x10xf32>
    %172 = vector.broadcast %171 : vector<1x10xf32> to vector<16x10xf32>
    %173 = arith.addf %170, %172 : vector<16x10xf32>
    %cst_65 = arith.constant 0.000000e+00 : f32
    %174 = vector.broadcast %cst_65 : f32 to vector<16x10xf32>
    %175 = arith.maximumf %173, %174 : vector<16x10xf32>
    %cst_66 = arith.constant 1.000000e+00 : f32
    %176 = vector.broadcast %cst_66 : f32 to vector<16x1xf32>
    %177 = arith.addf %176, %131 : vector<16x1xf32>
    %178 = vector.broadcast %177 : vector<16x1xf32> to vector<16x8xf32>
    %179 = arith.mulf %96, %178 : vector<16x8xf32>
    %c184 = arith.constant 184 : index
    %c0_67 = arith.constant 0 : index
    %180 = vector.load %arg1[%c184, %c0_67] : memref<200x128xf32, #tpu.memory_space<vmem>>, vector<8x10xf32>
    %c192 = arith.constant 192 : index
    %c0_68 = arith.constant 0 : index
    %181 = vector.load %arg1[%c192, %c0_68] : memref<200x128xf32, #tpu.memory_space<vmem>>, vector<1x10xf32>
    %cst_69 = arith.constant dense<0.000000e+00> : vector<16x10xf32>
    %182 = tpu.matmul %179, %180, %cst_69 {dimension_numbers = #tpu.dot_dimension_numbers<[1], [0], [0], [1], [0, 0, 1, 1], [], []>} : vector<16x8xf32>, vector<8x10xf32>, vector<16x10xf32> -> vector<16x10xf32>
    %183 = vector.broadcast %181 : vector<1x10xf32> to vector<16x10xf32>
    %184 = arith.addf %182, %183 : vector<16x10xf32>
    %185 = arith.addf %175, %184 : vector<16x10xf32>
    %cst_70 = arith.constant 0.000000e+00 : f32
    %186 = vector.broadcast %cst_70 : f32 to vector<16x10xf32>
    %187 = arith.maximumf %185, %186 : vector<16x10xf32>
    %cst_71 = arith.constant 0.000000e+00 : f32
    %188 = vector.broadcast %cst_71 : f32 to vector<16x118xf32>
    %189 = tpu.concatenate %187, %188 in 1 : vector<16x10xf32>, vector<16x118xf32> -> vector<16x128xf32>
    %c0_72 = arith.constant 0 : index
    %c0_73 = arith.constant 0 : index
    %c0_74 = arith.constant 0 : index
    %190 = vector.load %arg2[%c0_72, %c0_73, %c0_74] : memref<2x16x128xf32, #tpu.memory_space<vmem>>, vector<1x16x128xf32>
    %191 = vector.shape_cast %190 : vector<1x16x128xf32> to vector<16x128xf32>
    %192 = vector.shape_cast %189 : vector<16x128xf32> to vector<1x16x128xf32>
    tpu.vector_store %arg2[%c0_72, %c0_73, %c0_74], %192 {strides = array<i32>} : memref<2x16x128xf32, #tpu.memory_space<vmem>>, vector<1x16x128xf32>,
    %c1 = arith.constant 1 : index
    %c0_75 = arith.constant 0 : index
    %c0_76 = arith.constant 0 : index
    %193 = vector.load %arg0[%c1, %c0_75, %c0_76] : memref<2x16x6xf32, #tpu.memory_space<vmem>>, vector<1x16x6xf32>
    %194 = vector.shape_cast %193 : vector<1x16x6xf32> to vector<16x6xf32>
    %c0_77 = arith.constant 0 : index
    %c0_78 = arith.constant 0 : index
    %195 = vector.load %arg1[%c0_77, %c0_78] : memref<200x128xf32, #tpu.memory_space<vmem>>, vector<6x14xf32>
    %c8_79 = arith.constant 8 : index
    %c0_80 = arith.constant 0 : index
    %196 = vector.load %arg1[%c8_79, %c0_80] : memref<200x128xf32, #tpu.memory_space<vmem>>, vector<1x14xf32>
    %cst_81 = arith.constant dense<0.000000e+00> : vector<16x14xf32>
    %197 = tpu.matmul %194, %195, %cst_81 {dimension_numbers = #tpu.dot_dimension_numbers<[1], [0], [0], [1], [0, 0, 1, 1], [], []>} : vector<16x6xf32>, vector<6x14xf32>, vector<16x14xf32> -> vector<16x14xf32>
    %198 = vector.broadcast %196 : vector<1x14xf32> to vector<16x14xf32>
    %199 = arith.addf %197, %198 : vector<16x14xf32>
    %200 = vector.extract_strided_slice %199 {offsets = [0, 0], sizes = [16, 4], strides = [1, 1]} : vector<16x14xf32> to vector<16x4xf32>
    %201 = vector.extract_strided_slice %199 {offsets = [0, 4], sizes = [16, 4], strides = [1, 1]} : vector<16x14xf32> to vector<16x4xf32>
    %202 = vector.extract_strided_slice %199 {offsets = [0, 8], sizes = [16, 6], strides = [1, 1]} : vector<16x14xf32> to vector<16x6xf32>
    %203 = tpu.transpose %201, [1, 0] : vector<16x4xf32> -> vector<4x16xf32>
    %cst_82 = arith.constant dense<0.000000e+00> : vector<16x16xf32>
    %204 = tpu.matmul %200, %203, %cst_82 {dimension_numbers = #tpu.dot_dimension_numbers<[1], [0], [0], [1], [0, 0, 1, 1], [], []>} : vector<16x4xf32>, vector<4x16xf32>, vector<16x16xf32> -> vector<16x16xf32>
    %cst_83 = arith.constant 0xFF800000 : f32
    %205 = vector.broadcast %cst_83 : f32 to vector<16x16xf32>
    %206 = arith.select %2, %205, %204 : vector<16x16xi1>, vector<16x16xf32>
    %cst_84 = arith.constant dense<0xFF800000> : vector<16xf32>
    %207 = vector.multi_reduction <maximumf>, %206, %cst_84 [0] : vector<16x16xf32> to vector<16xf32>
    %208 = vector.shape_cast %207 : vector<16xf32> to vector<1x16xf32>
    %209 = vector.broadcast %208 : vector<1x16xf32> to vector<16x16xf32>
    %210 = arith.subf %206, %209 : vector<16x16xf32>
    %211 = math.exp %210 : vector<16x16xf32>
    %cst_85 = arith.constant dense<0.000000e+00> : vector<16xf32>
    %212 = vector.multi_reduction <add>, %211, %cst_85 [0] : vector<16x16xf32> to vector<16xf32>
    %213 = vector.shape_cast %212 : vector<16xf32> to vector<1x16xf32>
    %214 = tpu.reciprocal %213 {approx = true} : vector<1x16xf32> -> vector<1x16xf32>
    %215 = vector.broadcast %214 : vector<1x16xf32> to vector<16x16xf32>
    %216 = arith.mulf %211, %215 : vector<16x16xf32>
    %cst_86 = arith.constant dense<0.000000e+00> : vector<16x6xf32>
    %217 = tpu.matmul %216, %202, %cst_86 {dimension_numbers = #tpu.dot_dimension_numbers<[1], [0], [0], [1], [0, 0, 1, 1], [], []>} : vector<16x16xf32>, vector<16x6xf32>, vector<16x6xf32> -> vector<16x6xf32>
    %cst_87 = arith.constant dense<0.000000e+00> : vector<16xf32>
    %218 = vector.multi_reduction <add>, %216, %cst_87 [1] : vector<16x16xf32> to vector<16xf32>
    %219 = vector.shape_cast %218 : vector<16xf32> to vector<16x1xf32>
    %cst_88 = arith.constant dense<0xFF800000> : vector<1xf32>
    %220 = vector.multi_reduction <maximumf>, %219, %cst_88 [0] : vector<16x1xf32> to vector<1xf32>
    %221 = vector.shape_cast %220 : vector<1xf32> to vector<1x1xf32>
    %222 = vector.broadcast %221 : vector<1x1xf32> to vector<16x1xf32>
    %223 = arith.subf %219, %222 : vector<16x1xf32>
    %224 = math.exp %223 : vector<16x1xf32>
    %cst_89 = arith.constant dense<0.000000e+00> : vector<1xf32>
    %225 = vector.multi_reduction <add>, %224, %cst_89 [0] : vector<16x1xf32> to vector<1xf32>
    %226 = vector.shape_cast %225 : vector<1xf32> to vector<1x1xf32>
    %227 = tpu.reciprocal %226 {approx = true} : vector<1x1xf32> -> vector<1x1xf32>
    %228 = vector.broadcast %227 : vector<1x1xf32> to vector<16x1xf32>
    %229 = arith.mulf %224, %228 : vector<16x1xf32>
    %c2_i32_90 = arith.constant 2 : i32
    %230 = tpu.dynamic_rotate %217 by %c2_i32_90 dim 0 : vector<16x6xf32>, i32 -> vector<16x6xf32>
    %c2_i32_91 = arith.constant 2 : i32
    %231 = vector.broadcast %c2_i32_91 : i32 to vector<16x1xi32>
    %232 = arith.cmpi slt, %3, %231 : vector<16x1xi32>
    %cst_92 = arith.constant 0.000000e+00 : f32
    %233 = vector.shape_cast %232 : vector<16x1xi1> to vector<16x1xi1>
    %234 = vector.broadcast %233 : vector<16x1xi1> to vector<16x6xi1>
    %235 = vector.broadcast %cst_92 : f32 to vector<16x6xf32>
    %236 = arith.select %234, %235, %230 : vector<16x6xi1>, vector<16x6xf32>
    %c1_i32_93 = arith.constant 1 : i32
    %237 = tpu.dynamic_rotate %217 by %c1_i32_93 dim 0 : vector<16x6xf32>, i32 -> vector<16x6xf32>
    %c1_i32_94 = arith.constant 1 : i32
    %238 = vector.broadcast %c1_i32_94 : i32 to vector<16x1xi32>
    %239 = arith.cmpi slt, %3, %238 : vector<16x1xi32>
    %cst_95 = arith.constant 0.000000e+00 : f32
    %240 = vector.shape_cast %239 : vector<16x1xi1> to vector<16x1xi1>
    %241 = vector.broadcast %240 : vector<16x1xi1> to vector<16x6xi1>
    %242 = vector.broadcast %cst_95 : f32 to vector<16x6xf32>
    %243 = arith.select %241, %242, %237 : vector<16x6xi1>, vector<16x6xf32>
    %244 = tpu.concatenate %236, %243, %217 in 1 : vector<16x6xf32>, vector<16x6xf32>, vector<16x6xf32> -> vector<16x18xf32>
    %c16_96 = arith.constant 16 : index
    %c0_97 = arith.constant 0 : index
    %245 = vector.load %arg1[%c16_96, %c0_97] : memref<200x128xf32, #tpu.memory_space<vmem>>, vector<18x8xf32>
    %cst_98 = arith.constant dense<0.000000e+00> : vector<16x8xf32>
    %246 = tpu.matmul %244, %245, %cst_98 {dimension_numbers = #tpu.dot_dimension_numbers<[1], [0], [0], [1], [0, 0, 1, 1], [], []>} : vector<16x18xf32>, vector<18x8xf32>, vector<16x8xf32> -> vector<16x8xf32>
    %c40_99 = arith.constant 40 : index
    %c0_100 = arith.constant 0 : index
    %247 = vector.load %arg1[%c40_99, %c0_100] : memref<200x128xf32, #tpu.memory_space<vmem>>, vector<1x8xf32>
    %248 = vector.broadcast %247 : vector<1x8xf32> to vector<16x8xf32>
    %249 = arith.addf %246, %248 : vector<16x8xf32>
    %cst_101 = arith.constant 0.000000e+00 : f32
    %250 = vector.broadcast %cst_101 : f32 to vector<16x8xf32>
    %251 = arith.maximumf %249, %250 : vector<16x8xf32>
    %c2_i32_102 = arith.constant 2 : i32
    %252 = tpu.dynamic_rotate %251 by %c2_i32_102 dim 0 : vector<16x8xf32>, i32 -> vector<16x8xf32>
    %c2_i32_103 = arith.constant 2 : i32
    %253 = vector.broadcast %c2_i32_103 : i32 to vector<16x1xi32>
    %254 = arith.cmpi slt, %3, %253 : vector<16x1xi32>
    %cst_104 = arith.constant 0.000000e+00 : f32
    %255 = vector.shape_cast %254 : vector<16x1xi1> to vector<16x1xi1>
    %256 = vector.broadcast %255 : vector<16x1xi1> to vector<16x8xi1>
    %257 = vector.broadcast %cst_104 : f32 to vector<16x8xf32>
    %258 = arith.select %256, %257, %252 : vector<16x8xi1>, vector<16x8xf32>
    %c1_i32_105 = arith.constant 1 : i32
    %259 = tpu.dynamic_rotate %251 by %c1_i32_105 dim 0 : vector<16x8xf32>, i32 -> vector<16x8xf32>
    %c1_i32_106 = arith.constant 1 : i32
    %260 = vector.broadcast %c1_i32_106 : i32 to vector<16x1xi32>
    %261 = arith.cmpi slt, %3, %260 : vector<16x1xi32>
    %cst_107 = arith.constant 0.000000e+00 : f32
    %262 = vector.shape_cast %261 : vector<16x1xi1> to vector<16x1xi1>
    %263 = vector.broadcast %262 : vector<16x1xi1> to vector<16x8xi1>
    %264 = vector.broadcast %cst_107 : f32 to vector<16x8xf32>
    %265 = arith.select %263, %264, %259 : vector<16x8xi1>, vector<16x8xf32>
    %266 = tpu.concatenate %258, %265, %251 in 1 : vector<16x8xf32>, vector<16x8xf32>, vector<16x8xf32> -> vector<16x24xf32>
    %c48_108 = arith.constant 48 : index
    %c0_109 = arith.constant 0 : index
    %267 = vector.load %arg1[%c48_108, %c0_109] : memref<200x128xf32, #tpu.memory_space<vmem>>, vector<24x8xf32>
    %cst_110 = arith.constant dense<0.000000e+00> : vector<16x8xf32>
    %268 = tpu.matmul %266, %267, %cst_110 {dimension_numbers = #tpu.dot_dimension_numbers<[1], [0], [0], [1], [0, 0, 1, 1], [], []>} : vector<16x24xf32>, vector<24x8xf32>, vector<16x8xf32> -> vector<16x8xf32>
    %c72_111 = arith.constant 72 : index
    %c0_112 = arith.constant 0 : index
    %269 = vector.load %arg1[%c72_111, %c0_112] : memref<200x128xf32, #tpu.memory_space<vmem>>, vector<1x8xf32>
    %270 = vector.broadcast %269 : vector<1x8xf32> to vector<16x8xf32>
    %271 = arith.addf %268, %270 : vector<16x8xf32>
    %cst_113 = arith.constant 0.000000e+00 : f32
    %272 = vector.broadcast %cst_113 : f32 to vector<16x8xf32>
    %273 = arith.maximumf %271, %272 : vector<16x8xf32>
    %cst_114 = arith.constant 1.000000e+00 : f32
    %274 = vector.broadcast %cst_114 : f32 to vector<16x1xf32>
    %275 = arith.addf %274, %229 : vector<16x1xf32>
    %276 = vector.broadcast %275 : vector<16x1xf32> to vector<16x6xf32>
    %277 = arith.mulf %194, %276 : vector<16x6xf32>
    %c80_115 = arith.constant 80 : index
    %c0_116 = arith.constant 0 : index
    %278 = vector.load %arg1[%c80_115, %c0_116] : memref<200x128xf32, #tpu.memory_space<vmem>>, vector<6x8xf32>
    %c88_117 = arith.constant 88 : index
    %c0_118 = arith.constant 0 : index
    %279 = vector.load %arg1[%c88_117, %c0_118] : memref<200x128xf32, #tpu.memory_space<vmem>>, vector<1x8xf32>
    %cst_119 = arith.constant dense<0.000000e+00> : vector<16x8xf32>
    %280 = tpu.matmul %277, %278, %cst_119 {dimension_numbers = #tpu.dot_dimension_numbers<[1], [0], [0], [1], [0, 0, 1, 1], [], []>} : vector<16x6xf32>, vector<6x8xf32>, vector<16x8xf32> -> vector<16x8xf32>
    %281 = vector.broadcast %279 : vector<1x8xf32> to vector<16x8xf32>
    %282 = arith.addf %280, %281 : vector<16x8xf32>
    %283 = arith.addf %273, %282 : vector<16x8xf32>
    %cst_120 = arith.constant 0.000000e+00 : f32
    %284 = vector.broadcast %cst_120 : f32 to vector<16x8xf32>
    %285 = arith.maximumf %283, %284 : vector<16x8xf32>
    %c96_121 = arith.constant 96 : index
    %c0_122 = arith.constant 0 : index
    %286 = vector.load %arg1[%c96_121, %c0_122] : memref<200x128xf32, #tpu.memory_space<vmem>>, vector<8x16xf32>
    %c104_123 = arith.constant 104 : index
    %c0_124 = arith.constant 0 : index
    %287 = vector.load %arg1[%c104_123, %c0_124] : memref<200x128xf32, #tpu.memory_space<vmem>>, vector<1x16xf32>
    %cst_125 = arith.constant dense<0.000000e+00> : vector<16x16xf32>
    %288 = tpu.matmul %285, %286, %cst_125 {dimension_numbers = #tpu.dot_dimension_numbers<[1], [0], [0], [1], [0, 0, 1, 1], [], []>} : vector<16x8xf32>, vector<8x16xf32>, vector<16x16xf32> -> vector<16x16xf32>
    %289 = vector.broadcast %287 : vector<1x16xf32> to vector<16x16xf32>
    %290 = arith.addf %288, %289 : vector<16x16xf32>
    %291 = vector.extract_strided_slice %290 {offsets = [0, 0], sizes = [16, 4], strides = [1, 1]} : vector<16x16xf32> to vector<16x4xf32>
    %292 = vector.extract_strided_slice %290 {offsets = [0, 4], sizes = [16, 4], strides = [1, 1]} : vector<16x16xf32> to vector<16x4xf32>
    %293 = vector.extract_strided_slice %290 {offsets = [0, 8], sizes = [16, 8], strides = [1, 1]} : vector<16x16xf32> to vector<16x8xf32>
    %294 = tpu.transpose %292, [1, 0] : vector<16x4xf32> -> vector<4x16xf32>
    %cst_126 = arith.constant dense<0.000000e+00> : vector<16x16xf32>
    %295 = tpu.matmul %291, %294, %cst_126 {dimension_numbers = #tpu.dot_dimension_numbers<[1], [0], [0], [1], [0, 0, 1, 1], [], []>} : vector<16x4xf32>, vector<4x16xf32>, vector<16x16xf32> -> vector<16x16xf32>
    %cst_127 = arith.constant 0xFF800000 : f32
    %296 = vector.broadcast %cst_127 : f32 to vector<16x16xf32>
    %297 = arith.select %2, %296, %295 : vector<16x16xi1>, vector<16x16xf32>
    %cst_128 = arith.constant dense<0xFF800000> : vector<16xf32>
    %298 = vector.multi_reduction <maximumf>, %297, %cst_128 [0] : vector<16x16xf32> to vector<16xf32>
    %299 = vector.shape_cast %298 : vector<16xf32> to vector<1x16xf32>
    %300 = vector.broadcast %299 : vector<1x16xf32> to vector<16x16xf32>
    %301 = arith.subf %297, %300 : vector<16x16xf32>
    %302 = math.exp %301 : vector<16x16xf32>
    %cst_129 = arith.constant dense<0.000000e+00> : vector<16xf32>
    %303 = vector.multi_reduction <add>, %302, %cst_129 [0] : vector<16x16xf32> to vector<16xf32>
    %304 = vector.shape_cast %303 : vector<16xf32> to vector<1x16xf32>
    %305 = tpu.reciprocal %304 {approx = true} : vector<1x16xf32> -> vector<1x16xf32>
    %306 = vector.broadcast %305 : vector<1x16xf32> to vector<16x16xf32>
    %307 = arith.mulf %302, %306 : vector<16x16xf32>
    %cst_130 = arith.constant dense<0.000000e+00> : vector<16x8xf32>
    %308 = tpu.matmul %307, %293, %cst_130 {dimension_numbers = #tpu.dot_dimension_numbers<[1], [0], [0], [1], [0, 0, 1, 1], [], []>} : vector<16x16xf32>, vector<16x8xf32>, vector<16x8xf32> -> vector<16x8xf32>
    %cst_131 = arith.constant dense<0.000000e+00> : vector<16xf32>
    %309 = vector.multi_reduction <add>, %307, %cst_131 [1] : vector<16x16xf32> to vector<16xf32>
    %310 = vector.shape_cast %309 : vector<16xf32> to vector<16x1xf32>
    %cst_132 = arith.constant dense<0xFF800000> : vector<1xf32>
    %311 = vector.multi_reduction <maximumf>, %310, %cst_132 [0] : vector<16x1xf32> to vector<1xf32>
    %312 = vector.shape_cast %311 : vector<1xf32> to vector<1x1xf32>
    %313 = vector.broadcast %312 : vector<1x1xf32> to vector<16x1xf32>
    %314 = arith.subf %310, %313 : vector<16x1xf32>
    %315 = math.exp %314 : vector<16x1xf32>
    %cst_133 = arith.constant dense<0.000000e+00> : vector<1xf32>
    %316 = vector.multi_reduction <add>, %315, %cst_133 [0] : vector<16x1xf32> to vector<1xf32>
    %317 = vector.shape_cast %316 : vector<1xf32> to vector<1x1xf32>
    %318 = tpu.reciprocal %317 {approx = true} : vector<1x1xf32> -> vector<1x1xf32>
    %319 = vector.broadcast %318 : vector<1x1xf32> to vector<16x1xf32>
    %320 = arith.mulf %315, %319 : vector<16x1xf32>
    %c4_i32_134 = arith.constant 4 : i32
    %321 = tpu.dynamic_rotate %308 by %c4_i32_134 dim 0 : vector<16x8xf32>, i32 -> vector<16x8xf32>
    %c4_i32_135 = arith.constant 4 : i32
    %322 = vector.broadcast %c4_i32_135 : i32 to vector<16x1xi32>
    %323 = arith.cmpi slt, %3, %322 : vector<16x1xi32>
    %cst_136 = arith.constant 0.000000e+00 : f32
    %324 = vector.shape_cast %323 : vector<16x1xi1> to vector<16x1xi1>
    %325 = vector.broadcast %324 : vector<16x1xi1> to vector<16x8xi1>
    %326 = vector.broadcast %cst_136 : f32 to vector<16x8xf32>
    %327 = arith.select %325, %326, %321 : vector<16x8xi1>, vector<16x8xf32>
    %c2_i32_137 = arith.constant 2 : i32
    %328 = tpu.dynamic_rotate %308 by %c2_i32_137 dim 0 : vector<16x8xf32>, i32 -> vector<16x8xf32>
    %c2_i32_138 = arith.constant 2 : i32
    %329 = vector.broadcast %c2_i32_138 : i32 to vector<16x1xi32>
    %330 = arith.cmpi slt, %3, %329 : vector<16x1xi32>
    %cst_139 = arith.constant 0.000000e+00 : f32
    %331 = vector.shape_cast %330 : vector<16x1xi1> to vector<16x1xi1>
    %332 = vector.broadcast %331 : vector<16x1xi1> to vector<16x8xi1>
    %333 = vector.broadcast %cst_139 : f32 to vector<16x8xf32>
    %334 = arith.select %332, %333, %328 : vector<16x8xi1>, vector<16x8xf32>
    %335 = tpu.concatenate %327, %334, %308 in 1 : vector<16x8xf32>, vector<16x8xf32>, vector<16x8xf32> -> vector<16x24xf32>
    %c112_140 = arith.constant 112 : index
    %c0_141 = arith.constant 0 : index
    %336 = vector.load %arg1[%c112_140, %c0_141] : memref<200x128xf32, #tpu.memory_space<vmem>>, vector<24x10xf32>
    %cst_142 = arith.constant dense<0.000000e+00> : vector<16x10xf32>
    %337 = tpu.matmul %335, %336, %cst_142 {dimension_numbers = #tpu.dot_dimension_numbers<[1], [0], [0], [1], [0, 0, 1, 1], [], []>} : vector<16x24xf32>, vector<24x10xf32>, vector<16x10xf32> -> vector<16x10xf32>
    %c136_143 = arith.constant 136 : index
    %c0_144 = arith.constant 0 : index
    %338 = vector.load %arg1[%c136_143, %c0_144] : memref<200x128xf32, #tpu.memory_space<vmem>>, vector<1x10xf32>
    %339 = vector.broadcast %338 : vector<1x10xf32> to vector<16x10xf32>
    %340 = arith.addf %337, %339 : vector<16x10xf32>
    %cst_145 = arith.constant 0.000000e+00 : f32
    %341 = vector.broadcast %cst_145 : f32 to vector<16x10xf32>
    %342 = arith.maximumf %340, %341 : vector<16x10xf32>
    %c4_i32_146 = arith.constant 4 : i32
    %343 = tpu.dynamic_rotate %342 by %c4_i32_146 dim 0 : vector<16x10xf32>, i32 -> vector<16x10xf32>
    %c4_i32_147 = arith.constant 4 : i32
    %344 = vector.broadcast %c4_i32_147 : i32 to vector<16x1xi32>
    %345 = arith.cmpi slt, %3, %344 : vector<16x1xi32>
    %cst_148 = arith.constant 0.000000e+00 : f32
    %346 = vector.shape_cast %345 : vector<16x1xi1> to vector<16x1xi1>
    %347 = vector.broadcast %346 : vector<16x1xi1> to vector<16x10xi1>
    %348 = vector.broadcast %cst_148 : f32 to vector<16x10xf32>
    %349 = arith.select %347, %348, %343 : vector<16x10xi1>, vector<16x10xf32>
    %c2_i32_149 = arith.constant 2 : i32
    %350 = tpu.dynamic_rotate %342 by %c2_i32_149 dim 0 : vector<16x10xf32>, i32 -> vector<16x10xf32>
    %c2_i32_150 = arith.constant 2 : i32
    %351 = vector.broadcast %c2_i32_150 : i32 to vector<16x1xi32>
    %352 = arith.cmpi slt, %3, %351 : vector<16x1xi32>
    %cst_151 = arith.constant 0.000000e+00 : f32
    %353 = vector.shape_cast %352 : vector<16x1xi1> to vector<16x1xi1>
    %354 = vector.broadcast %353 : vector<16x1xi1> to vector<16x10xi1>
    %355 = vector.broadcast %cst_151 : f32 to vector<16x10xf32>
    %356 = arith.select %354, %355, %350 : vector<16x10xi1>, vector<16x10xf32>
    %357 = tpu.concatenate %349, %356, %342 in 1 : vector<16x10xf32>, vector<16x10xf32>, vector<16x10xf32> -> vector<16x30xf32>
    %c144_152 = arith.constant 144 : index
    %c0_153 = arith.constant 0 : index
    %358 = vector.load %arg1[%c144_152, %c0_153] : memref<200x128xf32, #tpu.memory_space<vmem>>, vector<30x10xf32>
    %cst_154 = arith.constant dense<0.000000e+00> : vector<16x10xf32>
    %359 = tpu.matmul %357, %358, %cst_154 {dimension_numbers = #tpu.dot_dimension_numbers<[1], [0], [0], [1], [0, 0, 1, 1], [], []>} : vector<16x30xf32>, vector<30x10xf32>, vector<16x10xf32> -> vector<16x10xf32>
    %c176_155 = arith.constant 176 : index
    %c0_156 = arith.constant 0 : index
    %360 = vector.load %arg1[%c176_155, %c0_156] : memref<200x128xf32, #tpu.memory_space<vmem>>, vector<1x10xf32>
    %361 = vector.broadcast %360 : vector<1x10xf32> to vector<16x10xf32>
    %362 = arith.addf %359, %361 : vector<16x10xf32>
    %cst_157 = arith.constant 0.000000e+00 : f32
    %363 = vector.broadcast %cst_157 : f32 to vector<16x10xf32>
    %364 = arith.maximumf %362, %363 : vector<16x10xf32>
    %cst_158 = arith.constant 1.000000e+00 : f32
    %365 = vector.broadcast %cst_158 : f32 to vector<16x1xf32>
    %366 = arith.addf %365, %320 : vector<16x1xf32>
    %367 = vector.broadcast %366 : vector<16x1xf32> to vector<16x8xf32>
    %368 = arith.mulf %285, %367 : vector<16x8xf32>
    %c184_159 = arith.constant 184 : index
    %c0_160 = arith.constant 0 : index
    %369 = vector.load %arg1[%c184_159, %c0_160] : memref<200x128xf32, #tpu.memory_space<vmem>>, vector<8x10xf32>
    %c192_161 = arith.constant 192 : index
    %c0_162 = arith.constant 0 : index
    %370 = vector.load %arg1[%c192_161, %c0_162] : memref<200x128xf32, #tpu.memory_space<vmem>>, vector<1x10xf32>
    %cst_163 = arith.constant dense<0.000000e+00> : vector<16x10xf32>
    %371 = tpu.matmul %368, %369, %cst_163 {dimension_numbers = #tpu.dot_dimension_numbers<[1], [0], [0], [1], [0, 0, 1, 1], [], []>} : vector<16x8xf32>, vector<8x10xf32>, vector<16x10xf32> -> vector<16x10xf32>
    %372 = vector.broadcast %370 : vector<1x10xf32> to vector<16x10xf32>
    %373 = arith.addf %371, %372 : vector<16x10xf32>
    %374 = arith.addf %364, %373 : vector<16x10xf32>
    %cst_164 = arith.constant 0.000000e+00 : f32
    %375 = vector.broadcast %cst_164 : f32 to vector<16x10xf32>
    %376 = arith.maximumf %374, %375 : vector<16x10xf32>
    %cst_165 = arith.constant 0.000000e+00 : f32
    %377 = vector.broadcast %cst_165 : f32 to vector<16x118xf32>
    %378 = tpu.concatenate %376, %377 in 1 : vector<16x10xf32>, vector<16x118xf32> -> vector<16x128xf32>
    %c1_166 = arith.constant 1 : index
    %c0_167 = arith.constant 0 : index
    %c0_168 = arith.constant 0 : index
    %379 = vector.load %arg2[%c1_166, %c0_167, %c0_168] : memref<2x16x128xf32, #tpu.memory_space<vmem>>, vector<1x16x128xf32>
    %380 = vector.shape_cast %379 : vector<1x16x128xf32> to vector<16x128xf32>
    %381 = vector.shape_cast %378 : vector<16x128xf32> to vector<1x16x128xf32>
    tpu.vector_store %arg2[%c1_166, %c0_167, %c0_168], %381 {strides = array<i32>} : memref<2x16x128xf32, #tpu.memory_space<vmem>>, vector<1x16x128xf32>,
    return
  }
}

</mosaic_0001>

<bundles_post_ra>
// kernel: _lambda_.1
= control target key start
LH: loop header
LB: loop body
LE: loop exit
PB: predicated region body
PF: predicated region fallthrough
CT: control target
= control target key end

     0   :  { %7 = vsyncpa [#allocation3], 0  ;;  %s1649_s12 = smov [#allocation2]   ;;  %s1650_s14 = smov 128   ;;  %s2115_s0 = inlined_call_operand.vmem [shape: f32[2,16,6], index: 0, kind: input, shape index: {}]   ;;  %s2116_s1 = inlined_call_operand.hbm [shape: f32[200,128], index: 1, kind: input, shape index: {}]   ;;  %s2117_s2 = inlined_call_operand.vmem [shape: f32[2,16,128], index: 2, kind: output, shape index: {}]  }
   0x1   :  { %s14_s11 = sshll.u32 %s2116_s1, 4  ;;  %s16_s13 = sshll.u32 %s1649_s12, 4  ;;  %s15_s11 = int_to_ptr.hbm [resolvable:$true] %s14_s11  ;;  %s17_s13 = int_to_ptr.vmem [resolvable:$true] %s16_s13 }
   0x2   :  { %s1651_s15 = smov 8  }
   0x3   :  { %22 = dma.hbm_to_vmem [thread:$0]  %s15_s11, 3200, %s17_s13, [#allocation3], %s1650_s14, %s1650_s14, %s1651_s15  }
   0x4   :  { %1647 = dma.done.wait [#allocation3], 3200  }
   0x5   :  { %1648 = vsyncadd [#allocation3], 4294964096  ;;  %vm46_vm0 = vcmask 1045504   ;;  %vm39_vm1 = vcmask 48128   ;;  %v36_v0 = vld [vmem:[#allocation2] sm:$0x3f]  ;;  %v27_v14 = vlaneseq }
   0x6   :  { %v1681_v1 = vld [vmem:[%s2115_s0] sm:$0xff]  ;;  %1461 = vmatpush.msk.msra.mxu0 %vm46_vm0, %v36_v0  ;;  %v1689_v2 = vld [vmem:[%s2115_s0 + $0x8] sm:$0xff]  ;;  %s1652_s19 = smov 124   ;;  %s1653_s20 = smov 120   ;;  %vm79_vm2 = vcmask 31744   ;;  %vm113_vm5 = vcmask 130048  }
   0x7   :  { %1462 = vmatmul.msk.f32.vlgmr.msra.gmra.mxu0 %vm39_vm1, %v1681_v1  ;;  %v1559_v4 = vld [vmem:[#allocation2 + $0x8] ss:$0 sm:$0xff]  ;;  %v1700_v15 = vshrl.u32 %v27_v14, 7  ;;  %v1702_v16 = vand.u32 127, %v27_v14  ;;  %s1654_s21 = smov 12   ;;  %s1655_s22 = smov 6  }
   0x8   :  { %v252_v58 = vld [vmem:[#allocation2 + $0x20] sm:$0x3]  ;;  %vm262_vm7 = vcmask 1041408   ;;  %v1736_v59 = vld [vmem:[#allocation2 + $0x18] sm:$0xff]  ;;  %v1740_v60 = vld [vmem:[#allocation2 + $0x10] sm:$0xff]  ;;  %vm255_vm9 = vcmask 146432  }
   0x9   :  { %v1705_v18 = vadd.s32 8, %v1700_v15  ;;  %vm32_vm3 = vcmp.gt.s32.totalorder %v1702_v16, %v1700_v15  ;;  %vm219_vm6 = vcmp.lt.s32.totalorder %v1700_v15, 1  ;;  %1470 = vmatpush.msk.msra.mxu3 %vm262_vm7, %v252_v58  ;;  %vm207_vm8 = vcmp.lt.s32.totalorder %v1700_v15, 2  ;;  %s1656_s23 = smov 16   ;;  %s1658_s28 = smov 10  }
   0xa   :  { %vm247_vm10 = vcmask 97280   ;;  %vm319_vm11 = vcmask 64512   ;;  %vm329_vm12 = vcmask 195584   ;;  %vm568_vm13 = vcmp.lt.s32.totalorder %v1700_v15, 4 }
   0xb   :  { %vm2118_vm4 = vcmp.gt.s32.totalorder %v1702_v16, %v1705_v18  ;;  %280 = vmatpush.msra.mxu3 %v1736_v59  ;;  %vm668_vm14 = vcmask 80896   ;;  %vm671_vm15 = vcmask 162816  }
   0xd   :  { %281 = vmatpush.msra.mxu3 %v1740_v60 }
   0xf   :  { %1463 = vmatmul.msk.f32.gmra.mxu0 %vm39_vm1, %v1689_v2 }
  0x84   :  { %v67_v3 = vpop.f32.mrf.mxu0 }
  0x85   :  { %v68_v6 = vadd.f32 %v1559_v4, %v67_v3 }
  0x8c   :  { %v70_v5 = vpop.f32.mrf.mxu0 }
  0x8d   :  { %v71_v7 = vadd.f32 %v1559_v4, %v70_v5 }
  0x8f   :  { %77 = vrot.lane.b32.xlu0 %v71_v7, %s1652_s19  ;;  %v1539_v8 = vpack.i.bf16 %v68_v6, %v71_v7 }
  0x91   :  { %1540 = vrot.lane.b32.xlu1 %v1539_v8, %s1653_s20 }
  0x97   :  { %75 = vrot.lane.b32.xlu0 %v68_v6, %s1652_s19 }
 0x101   :  { %v78_v9 = vpop.permute.xlu0 %77 }
 0x102   :  { %1464 = vmatpush.xpose.msk.msra.mxu1 %vm79_vm2, %v78_v9 }
 0x103   :  { %v1541_v10 = vpop.permute.xlu1 %1540 }
 0x104   :  { %v1542_v11 = vunpack.i.l.bf16 %v1541_v10  ;;  %v1543_v12 = vunpack.i.h.bf16 %v1541_v10 }
 0x106   :  { %167 = vmatpush.msra.mxu2 %v1542_v11 }
 0x108   :  { %168 = vmatpush.msra.mxu2 %v1543_v12 }
 0x109   :  { %v76_v13 = vpop.permute.xlu0 %75 }
 0x10a   :  { %1465 = vmatpush.xpose.msk.msra.mxu1 %vm79_vm2, %v76_v13 }
 0x10d   :  { %1466 = vmatmul.msk.f32.vlgmr.msra.gmra.mxu1 %vm79_vm2, %v68_v6 }
 0x115   :  { %1467 = vmatmul.msk.f32.gmra.mxu1 %vm79_vm2, %v71_v7 }
 0x18a   :  { %v105_v17 = vpop.f32.mrf.mxu1 }
 0x18b   :  { %v111_v19 = vsel %vm32_vm3, -inf, %v105_v17 }
 0x18c   :  { %v114_v22 = vsel %vm113_vm5, %v111_v19, -inf }
 0x192   :  { %v108_v20 = vpop.f32.mrf.mxu1 }
 0x193   :  { %v112_v21 = vsel %vm2118_vm4, -inf, %v108_v20 }
 0x194   :  { %v115_v23 = vsel %vm113_vm5, %v112_v21, -inf }
 0x195   :  { %v116_v24 = vmax.f32 %v114_v22, %v115_v23 }
 0x197   :  { %v117_v25 = vrot.slane %v116_v24, 4 }
 0x199   :  { %v118_v26 = vmax.f32 %v116_v24, %v117_v25 }
 0x19b   :  { %v119_v27 = vrot.slane %v118_v26, 2 }
 0x19d   :  { %v120_v28 = vmax.f32 %v118_v26, %v119_v27  ;;  %v365_v26 = vld [vmem:[#allocation2 + $0x50] sm:$0x3f] }
 0x19e   :  { %1475 = vmatpush.msk.msrb.mxu2 %vm46_vm0, %v365_v26 }
 0x19f   :  { %v121_v29 = vrot.slane %v120_v28, 1 }
 0x1a1   :  { %v122_v30 = vmax.f32 %v120_v28, %v121_v29 }
 0x1a3   :  { %v123_v31 = vsub.f32 %v111_v19, %v122_v30  ;;  %v124_v32 = vsub.f32 %v112_v21, %v122_v30 }
 0x1a5   :  { %v125_v33 = vmul.f32 1.442695, %v123_v31  ;;  %v127_v34 = vmul.f32 1.442695, %v124_v32 }
 0x1a7   :  { %1575 = vpow2.f32 %v125_v33 }
 0x1a8   :  { %1577 = vpow2.f32 %v127_v34 }
 0x1ad   :  { %v1576_v35 = vpop.eup %1575 }
 0x1ae   :  { %v1578_v36 = vpop.eup %1577  ;;  %v129_v37 = vsel %vm113_vm5, %v1576_v35, 0.0 }
 0x1af   :  { %v130_v38 = vsel %vm113_vm5, %v1578_v36, 0.0 }
 0x1b0   :  { %v131_v39 = vadd.f32 %v130_v38, %v129_v37 }
 0x1b2   :  { %v132_v40 = vrot.slane %v131_v39, 4 }
 0x1b4   :  { %v133_v41 = vadd.f32 %v132_v40, %v131_v39 }
 0x1b6   :  { %v134_v42 = vrot.slane %v133_v41, 2 }
 0x1b8   :  { %v135_v43 = vadd.f32 %v134_v42, %v133_v41 }
 0x1ba   :  { %v136_v44 = vrot.slane %v135_v43, 1 }
 0x1bc   :  { %v137_v45 = vadd.f32 %v136_v44, %v135_v43 }
 0x1be   :  { %1579 = vrcp.f32 %v137_v45  ;;  %v1560_v45 = vld [vmem:[#allocation2 + $0x28] ss:$0 sm:$0xff] }
 0x1c4   :  { %v1580_v46 = vpop.eup %1579 }
 0x1c5   :  { %v139_v47 = vmul.f32 %v1580_v46, %v1576_v35  ;;  %v140_v48 = vmul.f32 %v1580_v46, %v1578_v36 }
 0x1c7   :  { %1468 = vmatmul.msk.f32.vlgmr.msra.gmra.mxu2 %vm113_vm5, %v139_v47  ;;  %v179_v56 = vsel %vm113_vm5, %v140_v48, 0.0  ;;  %v176_v57 = vsel %vm113_vm5, %v139_v47, 0.0 }
 0x1cf   :  { %1469 = vmatmul.msk.f32.gmra.mxu2 %vm113_vm5, %v140_v48 }
 0x24a   :  { %v170_v49 = vpop.f32.mrf.mxu2 }
 0x24b   :  { %239 = vrot.lane.b32.xlu2 %v170_v49, %s1654_s21  ;;  %v217_v51 = vrot.slane %v170_v49, 7  ;;  %v205_v62 = vrot.slane %v170_v49, 6 }
 0x252   :  { %v173_v50 = vpop.f32.mrf.mxu2 }
 0x253   :  { %v218_v52 = vrot.slane %v173_v50, 7  ;;  %241 = vrot.lane.b32.xlu0 %v173_v50, %s1654_s21  ;;  %v206_v61 = vrot.slane %v173_v50, 6 }
 0x255   :  { %v220_v53 = vsel %vm219_vm6, %v217_v51, %v218_v52  ;;  %v221_v54 = vsel %vm219_vm6, %v218_v52, %v217_v51  ;;  %v209_v63 = vsel %vm207_vm8, %v206_v61, %v205_v62  ;;  %v208_v9 = vsel %vm207_vm8, %v205_v62, %v206_v61  ;;  %v1775_v61 = vld [vmem:[#allocation2 + $0x40] sm:$0xff]  ;;  %v1777_v62 = vld [vmem:[#allocation2 + $0x38] sm:$0xff] }
 0x256   :  { %233 = vrot.lane.b32.xlu2 %v220_v53, %s1655_s22  ;;  %v227_v55 = vsel %vm219_vm6, 0.0, %v221_v54  ;;  %v215_v4 = vsel %vm207_vm8, 0.0, %v209_v63  ;;  %349 = vmatpush.msrb.mxu0 %v1775_v61  ;;  %v1781_v63 = vld [vmem:[#allocation2 + $0x30] sm:$0xff] }
 0x257   :  { %231 = vrot.lane.b32.xlu1 %v227_v55, %s1655_s22 }
 0x258   :  { %350 = vmatpush.msrb.mxu0 %v1777_v62 }
 0x25a   :  { %351 = vmatpush.msrb.mxu0 %v1781_v63 }
 0x27f   :  { %180 = vadd.xlane.f32.xlu2 %v179_v56 }
 0x281   :  { %177 = vadd.xlane.f32.xlu1 %v176_v57 }
 0x2a5   :  { %v240_v0 = vpop.permute.xlu2 %239 }
 0x2b0   :  { %v234_v7 = vpop.permute.xlu2 %233 }
 0x2b1   :  { %v246_v10 = vsel %vm39_vm1, %v208_v9, %v234_v7 }
 0x2c5   :  { %v242_v8 = vpop.permute.xlu0 %241 }
 0x2c6   :  { %v249_v11 = vsel %vm247_vm10, %v246_v10, %v242_v8 }
 0x2c9   :  { %v232_v3 = vpop.permute.xlu1 %231 }
 0x2ca   :  { %v245_v5 = vsel %vm39_vm1, %v215_v4, %v232_v3 }
 0x2cb   :  { %v248_v6 = vsel %vm247_vm10, %v245_v5, %v240_v0 }
 0x2cc   :  { %1471 = vmatmul.msk.f32.vlgmr.msra.gmra.mxu3 %vm255_vm9, %v248_v6 }
 0x2d4   :  { %1472 = vmatmul.msk.f32.gmra.mxu3 %vm255_vm9, %v249_v11  ;;  %v1792_v11 = vld [vmem:[#allocation2 + $0x60] sm:$0xff] }
 0x2d5   :  { %428 = vmatpush.msrb.mxu3 %v1792_v11 }
 0x2f2   :  { %v181_v12 = vpop.xlane.xlu2 %180 }
 0x2f4   :  { %v178_v13 = vpop.xlane.xlu1 %177 }
 0x2f5   :  { %v182_v14 = vmax.f32 %v178_v13, %v181_v12 }
 0x2f7   :  { %v183_v17 = vrot.slane %v182_v14, 4 }
 0x2f9   :  { %v184_v19 = vmax.f32 %v182_v14, %v183_v17 }
 0x2fb   :  { %v185_v20 = vrot.slane %v184_v19, 2 }
 0x2fd   :  { %v186_v21 = vmax.f32 %v184_v19, %v185_v20 }
 0x2ff   :  { %v187_v22 = vrot.slane %v186_v21, 1 }
 0x301   :  { %v188_v23 = vmax.f32 %v186_v21, %v187_v22 }
 0x303   :  { %v189_v24 = vsub.f32 %v178_v13, %v188_v23  ;;  %v190_v25 = vsub.f32 %v181_v12, %v188_v23  ;;  %v1562_v12 = vld [vmem:[#allocation2 + $0x48] ss:$0 sm:$0xff]  ;;  %v1561_v13 = vld [vmem:[#allocation2 + $0x58] ss:$0 sm:$0xff] }
 0x305   :  { %v191_v27 = vmul.f32 1.442695, %v189_v24  ;;  %v193_v28 = vmul.f32 1.442695, %v190_v25 }
 0x307   :  { %1581 = vpow2.f32 %v191_v27 }
 0x308   :  { %1583 = vpow2.f32 %v193_v28 }
 0x30d   :  { %v1582_v29 = vpop.eup %1581 }
 0x30e   :  { %v1584_v30 = vpop.eup %1583 }
 0x30f   :  { %v195_v31 = vadd.f32 %v1584_v30, %v1582_v29 }
 0x311   :  { %v196_v32 = vrot.slane %v195_v31, 4 }
 0x313   :  { %v197_v33 = vadd.f32 %v196_v32, %v195_v31  ;;  %v1563_v31 = vld [vmem:[#allocation2 + $0x68] ss:$0 sm:$0xff] }
 0x315   :  { %v198_v34 = vrot.slane %v197_v33, 2 }
 0x317   :  { %v199_v35 = vadd.f32 %v198_v34, %v197_v33 }
 0x319   :  { %v200_v36 = vrot.slane %v199_v35, 1 }
 0x31b   :  { %v201_v37 = vadd.f32 %v200_v36, %v199_v35 }
 0x31d   :  { %1585 = vrcp.f32 %v201_v37 }
 0x323   :  { %v1586_v38 = vpop.eup %1585 }
 0x324   :  { %v203_v39 = vmul.f32 %v1586_v38, %v1582_v29  ;;  %v204_v42 = vmul.f32 %v1586_v38, %v1584_v30 }
 0x326   :  { %v361_v40 = vadd.f32 1.0, %v203_v39  ;;  %v362_v43 = vadd.f32 1.0, %v204_v42 }
 0x328   :  { %v363_v41 = vmul.f32 %v361_v40, %v1681_v1  ;;  %v364_v44 = vmul.f32 %v362_v43, %v1689_v2 }
 0x32a   :  { %1476 = vmatmul.msk.f32.vlgmr.msrb.gmra.mxu2 %vm39_vm1, %v363_v41 }
 0x332   :  { %1477 = vmatmul.msk.f32.gmra.mxu2 %vm39_vm1, %v364_v44 }
 0x34f   :  { %v283_v46 = vpop.f32.mrf.mxu3 }
 0x350   :  { %v284_v47 = vadd.f32 %v1560_v45, %v283_v46 }
 0x352   :  { %v289_v48 = vmax.f32 %v284_v47, 0.0 }
 0x354   :  { %313 = vrot.lane.b32.xlu0 %v289_v48, %s1656_s23  ;;  %v291_v52 = vrot.slane %v289_v48, 6  ;;  %v297_v1 = vrot.slane %v289_v48, 7 }
 0x357   :  { %v286_v49 = vpop.f32.mrf.mxu3 }
 0x358   :  { %v287_v50 = vadd.f32 %v1560_v45, %v286_v49 }
 0x35a   :  { %v290_v51 = vmax.f32 %v287_v50, 0.0 }
 0x35c   :  { %v292_v53 = vrot.slane %v290_v51, 6  ;;  %v298_v54 = vrot.slane %v290_v51, 7 }
 0x35e   :  { %v300_v55 = vsel %vm219_vm6, %v298_v54, %v297_v1  ;;  %v294_v2 = vsel %vm207_vm8, %v292_v53, %v291_v52  ;;  %v293_v56 = vsel %vm207_vm8, %v291_v52, %v292_v53  ;;  %v299_v58 = vsel %vm219_vm6, %v297_v1, %v298_v54 }
 0x35f   :  { %v301_v57 = vsel %vm219_vm6, 0.0, %v300_v55  ;;  %v295_v4 = vsel %vm207_vm8, 0.0, %v294_v2 }
 0x360   :  { %305 = vrot.lane.b32.xlu0 %v301_v57, %s1651_s15 }
 0x368   :  { %307 = vrot.lane.b32.xlu0 %v299_v58, %s1651_s15 }
 0x370   :  { %315 = vrot.lane.b32.xlu0 %v290_v51, %s1656_s23 }
 0x3ad   :  { %v394_v14 = vpop.f32.mrf.mxu2 }
 0x3ae   :  { %v395_v20 = vadd.f32 %v1561_v13, %v394_v14 }
 0x3b5   :  { %v397_v24 = vpop.f32.mrf.mxu2 }
 0x3b6   :  { %v398_v27 = vadd.f32 %v1561_v13, %v397_v24 }
 0x3c6   :  { %v314_v0 = vpop.permute.xlu0 %313 }
 0x3d2   :  { %v306_v3 = vpop.permute.xlu0 %305 }
 0x3d3   :  { %v320_v5 = vsel %vm319_vm11, %v295_v4, %v306_v3  ;;  %v762_v4 = vld [vmem:[#allocation2] sm:$0x3f] }
 0x3d4   :  { %v322_v6 = vsel %vm113_vm5, %v320_v5, %v314_v0 }
 0x3d5   :  { %1473 = vmatmul.msk.f32.vlgmr.msrb.gmra.mxu0 %vm329_vm12, %v322_v6 }
 0x3da   :  { %v308_v7 = vpop.permute.xlu0 %307 }
 0x3db   :  { %v321_v8 = vsel %vm319_vm11, %v293_v56, %v308_v7 }
 0x3e2   :  { %v316_v9 = vpop.permute.xlu0 %315 }
 0x3e3   :  { %v323_v10 = vsel %vm113_vm5, %v321_v8, %v316_v9 }
 0x3e4   :  { %1474 = vmatmul.msk.f32.gmra.mxu0 %vm329_vm12, %v323_v10 }
 0x452   :  { %v353_v17 = vpop.f32.mrf.mxu0 }
 0x453   :  { %v354_v19 = vadd.f32 %v1562_v12, %v353_v17 }
 0x455   :  { %v359_v21 = vmax.f32 %v354_v19, 0.0  ;;  %v1839_v19 = vld [vmem:[%s2115_s0 + $0x10] sm:$0xff] }
 0x457   :  { %v1795_v22 = vadd.f32 %v395_v20, %v359_v21 }
 0x459   :  { %v402_v23 = vmax.f32 %v1795_v22, 0.0 }
 0x45b   :  { %1478 = vmatmul.msk.f32.vlgmr.msrb.gmra.mxu3 %vm319_vm11, %v402_v23 }
 0x461   :  { %v356_v25 = vpop.f32.mrf.mxu0 }
 0x462   :  { %v357_v26 = vadd.f32 %v1562_v12, %v356_v25 }
 0x464   :  { %v360_v28 = vmax.f32 %v357_v26, 0.0 }
 0x466   :  { %v1801_v29 = vadd.f32 %v398_v27, %v360_v28 }
 0x468   :  { %v403_v30 = vmax.f32 %v1801_v29, 0.0 }
 0x46a   :  { %1479 = vmatmul.msk.f32.gmra.mxu3 %vm319_vm11, %v403_v30 }
 0x4de   :  { %v430_v32 = vpop.f32.mrf.mxu3 }
 0x4df   :  { %v431_v33 = vadd.f32 %v1563_v31, %v430_v32 }
 0x4e1   :  { %438 = vrot.lane.b32.xlu2 %v431_v33, %s1652_s19 }
 0x4ed   :  { %v433_v34 = vpop.f32.mrf.mxu3 }
 0x4ee   :  { %v434_v35 = vadd.f32 %v1563_v31, %v433_v34  ;;  %v1564_v34 = vld [vmem:[#allocation2 + $0x8] ss:$0 sm:$0xff] }
 0x4f0   :  { %440 = vrot.lane.b32.xlu0 %v434_v35, %s1652_s19  ;;  %v1544_v36 = vpack.i.bf16 %v431_v33, %v434_v35 }
 0x4f2   :  { %1545 = vrot.lane.b32.xlu1 %v1544_v36, %s1653_s20 }
 0x53b   :  { %v439_v40 = vpop.permute.xlu2 %438 }
 0x562   :  { %v441_v37 = vpop.permute.xlu0 %440 }
 0x563   :  { %1480 = vmatpush.xpose.msk.msrb.mxu1 %vm79_vm2, %v441_v37 }
 0x564   :  { %v1546_v38 = vpop.permute.xlu1 %1545 }
 0x565   :  { %v1547_v39 = vunpack.i.l.bf16 %v1546_v38  ;;  %v1548_v41 = vunpack.i.h.bf16 %v1546_v38  ;;  %v1867_v38 = vld [vmem:[#allocation2 + $0x80] sm:$0xff] }
 0x566   :  { %628 = vmatpush.msra.mxu2 %v1867_v38 }
 0x567   :  { %1481 = vmatpush.xpose.msk.msrb.mxu1 %vm79_vm2, %v439_v40  ;;  %528 = vmatpush.msra.mxu0 %v1547_v39  ;;  %v1869_v39 = vld [vmem:[#allocation2 + $0x78] sm:$0xff]  ;;  %v1873_v40 = vld [vmem:[#allocation2 + $0x70] sm:$0xff] }
 0x568   :  { %629 = vmatpush.msra.mxu2 %v1869_v39 }
 0x569   :  { %529 = vmatpush.msra.mxu0 %v1548_v41 }
 0x56a   :  { %1482 = vmatmul.msk.f32.vlgmr.msrb.gmra.mxu1 %vm79_vm2, %v431_v33  ;;  %630 = vmatpush.msra.mxu2 %v1873_v40 }
 0x56b   :  { %1495 = vmatpush.msk.msrb.mxu0 %vm46_vm0, %v762_v4 }
 0x572   :  { %1483 = vmatmul.msk.f32.gmra.mxu1 %vm79_vm2, %v434_v35 }
 0x5e7   :  { %v467_v42 = vpop.f32.mrf.mxu1 }
 0x5e8   :  { %v473_v43 = vsel %vm32_vm3, -inf, %v467_v42 }
 0x5e9   :  { %v475_v46 = vsel %vm113_vm5, %v473_v43, -inf }
 0x5ef   :  { %v470_v44 = vpop.f32.mrf.mxu1 }
 0x5f0   :  { %v474_v45 = vsel %vm2118_vm4, -inf, %v470_v44 }
 0x5f1   :  { %v476_v47 = vsel %vm113_vm5, %v474_v45, -inf }
 0x5f2   :  { %v477_v48 = vmax.f32 %v475_v46, %v476_v47 }
 0x5f4   :  { %v478_v49 = vrot.slane %v477_v48, 4 }
 0x5f6   :  { %v479_v50 = vmax.f32 %v477_v48, %v478_v49 }
 0x5f8   :  { %v480_v51 = vrot.slane %v479_v50, 2 }
 0x5fa   :  { %v481_v52 = vmax.f32 %v479_v50, %v480_v51 }
 0x5fc   :  { %v482_v1 = vrot.slane %v481_v52, 1 }
 0x5fe   :  { %v483_v53 = vmax.f32 %v481_v52, %v482_v1  ;;  %v1565_v52 = vld [vmem:[#allocation2 + $0x88] ss:$0 sm:$0xff] }
 0x600   :  { %v484_v54 = vsub.f32 %v473_v43, %v483_v53  ;;  %v485_v55 = vsub.f32 %v474_v45, %v483_v53 }
 0x602   :  { %v486_v2 = vmul.f32 1.442695, %v484_v54  ;;  %v488_v56 = vmul.f32 1.442695, %v485_v55 }
 0x604   :  { %1587 = vpow2.f32 %v486_v2 }
 0x605   :  { %1589 = vpow2.f32 %v488_v56 }
 0x60a   :  { %v1588_v57 = vpop.eup %1587 }
 0x60b   :  { %v1590_v58 = vpop.eup %1589  ;;  %v490_v0 = vsel %vm113_vm5, %v1588_v57, 0.0 }
 0x60c   :  { %v491_v3 = vsel %vm113_vm5, %v1590_v58, 0.0 }
 0x60d   :  { %v492_v5 = vadd.f32 %v491_v3, %v490_v0 }
 0x60f   :  { %v493_v6 = vrot.slane %v492_v5, 4 }
 0x611   :  { %v494_v7 = vadd.f32 %v493_v6, %v492_v5 }
 0x613   :  { %v495_v8 = vrot.slane %v494_v7, 2 }
 0x615   :  { %v496_v9 = vadd.f32 %v495_v8, %v494_v7 }
 0x617   :  { %v497_v10 = vrot.slane %v496_v9, 1 }
 0x619   :  { %v498_v12 = vadd.f32 %v497_v10, %v496_v9 }
 0x61b   :  { %1591 = vrcp.f32 %v498_v12 }
 0x621   :  { %v1592_v13 = vpop.eup %1591 }
 0x622   :  { %v1825_v14 = vmul.f32 %v1592_v13, %v1588_v57  ;;  %v1832_v17 = vmul.f32 %v1592_v13, %v1590_v58 }
 0x624   :  { %1484 = vmatmul.msk.f32.vlgmr.msra.gmra.mxu0 %vm113_vm5, %v1825_v14 }
 0x625   :  { %1054 = vmatpush.msra.mxu0 %v1775_v61  ;;  %v1846_v61 = vld [vmem:[%s2115_s0 + $0x18] sm:$0xff]  ;;  %s1657_s0 = smov 20  }
 0x627   :  { %1055 = vmatpush.msra.mxu0 %v1777_v62 }
 0x629   :  { %1056 = vmatpush.msra.mxu0 %v1781_v63 }
 0x62c   :  { %1485 = vmatmul.msk.f32.gmra.mxu0 %vm113_vm5, %v1832_v17 }
 0x634   :  { %1496 = vmatmul.msk.f32.vlgmr.msrb.gmra.mxu0 %vm39_vm1, %v1839_v19 }
 0x63c   :  { %1497 = vmatmul.msk.f32.gmra.mxu0 %vm39_vm1, %v1846_v61 }
 0x6a1   :  { %v531_v62 = vpop.f32.mrf.mxu0 }
 0x6a2   :  { %594 = vrot.lane.b32.xlu0 %v531_v62, %s1656_s23  ;;  %v566_v20 = vrot.slane %v531_v62, 4  ;;  %v578_v21 = vrot.slane %v531_v62, 6 }
 0x6a9   :  { %v534_v63 = vpop.f32.mrf.mxu0 }
 0x6aa   :  { %v567_v24 = vrot.slane %v534_v63, 4  ;;  %v579_v25 = vrot.slane %v534_v63, 6  ;;  %596 = vrot.lane.b32.xlu2 %v534_v63, %s1656_s23 }
 0x6ac   :  { %v581_v26 = vsel %vm207_vm8, %v579_v25, %v578_v21  ;;  %v570_v27 = vsel %vm568_vm13, %v567_v24, %v566_v20  ;;  %v569_v28 = vsel %vm568_vm13, %v566_v20, %v567_v24  ;;  %v580_v33 = vsel %vm207_vm8, %v578_v21, %v579_v25 }
 0x6ad   :  { %v582_v31 = vsel %vm207_vm8, 0.0, %v581_v26  ;;  %v576_v43 = vsel %vm568_vm13, 0.0, %v570_v27 }
 0x6ae   :  { %586 = vrot.lane.b32.xlu0 %v582_v31, %s1651_s15 }
 0x6b1   :  { %v791_v32 = vpop.f32.mrf.mxu0 }
 0x6b2   :  { %v792_v36 = vadd.f32 %v1564_v34, %v791_v32 }
 0x6b6   :  { %588 = vrot.lane.b32.xlu0 %v580_v33, %s1651_s15 }
 0x6b9   :  { %v794_v35 = vpop.f32.mrf.mxu0 }
 0x6ba   :  { %v795_v37 = vadd.f32 %v1564_v34, %v794_v35 }
 0x6bc   :  { %801 = vrot.lane.b32.xlu1 %v795_v37, %s1652_s19  ;;  %v1549_v57 = vpack.i.bf16 %v792_v36, %v795_v37 }
 0x6be   :  { %799 = vrot.lane.b32.xlu0 %v792_v36, %s1652_s19 }
 0x704   :  { %v597_v47 = vpop.permute.xlu2 %596 }
 0x714   :  { %v595_v41 = vpop.permute.xlu0 %594 }
 0x720   :  { %v587_v42 = vpop.permute.xlu0 %586 }
 0x721   :  { %v600_v44 = vsel %vm319_vm11, %v576_v43, %v587_v42 }
 0x722   :  { %v602_v45 = vsel %vm113_vm5, %v600_v44, %v595_v41  ;;  %v537_v44 = vsel %vm113_vm5, %v1825_v14, 0.0 }
 0x723   :  { %1486 = vmatmul.msk.f32.vlgmr.msra.gmra.mxu2 %vm329_vm12, %v602_v45 }
 0x728   :  { %v589_v46 = vpop.permute.xlu0 %588 }
 0x729   :  { %v601_v48 = vsel %vm319_vm11, %v569_v28, %v589_v46 }
 0x72a   :  { %v603_v49 = vsel %vm113_vm5, %v601_v48, %v597_v47  ;;  %v540_v48 = vsel %vm113_vm5, %v1832_v17, 0.0  ;;  %v1929_v17 = vld [vmem:[#allocation2 + $0x90] sm:$0xff] }
 0x72b   :  { %1487 = vmatmul.msk.f32.gmra.mxu2 %vm329_vm12, %v603_v49 }
 0x72e   :  { %v802_v50 = vpop.permute.xlu1 %801 }
 0x72f   :  { %1498 = vmatpush.xpose.msk.msrb.mxu2 %vm79_vm2, %v802_v50 }
 0x730   :  { %v800_v51 = vpop.permute.xlu0 %799 }
 0x733   :  { %1499 = vmatpush.xpose.msk.msrb.mxu2 %vm79_vm2, %v800_v51 }
 0x736   :  { %1500 = vmatmul.msk.f32.vlgmr.msrb.gmra.mxu2 %vm79_vm2, %v792_v36 }
 0x73e   :  { %1501 = vmatmul.msk.f32.gmra.mxu2 %vm79_vm2, %v795_v37 }
 0x7a6   :  { %v632_v1 = vpop.f32.mrf.mxu2 }
 0x7a7   :  { %v633_v53 = vadd.f32 %v1565_v52, %v632_v1 }
 0x7a9   :  { %v638_v54 = vmax.f32 %v633_v53, 0.0 }
 0x7ab   :  { %662 = vrot.lane.b32.xlu1 %v638_v54, %s1657_s0  ;;  %v640_v58 = vrot.slane %v638_v54, 4  ;;  %v646_v0 = vrot.slane %v638_v54, 6 }
 0x7ae   :  { %v635_v55 = vpop.f32.mrf.mxu2 }
 0x7af   :  { %v636_v2 = vadd.f32 %v1565_v52, %v635_v55  ;;  %v677_v52 = vld [vmem:[#allocation2 + $0xa8] sm:$0x3f]  ;;  %v1923_v55 = vld [vmem:[#allocation2 + $0xa0] sm:$0xff] }
 0x7b0   :  { %1488 = vmatpush.msk.msra.mxu3 %vm46_vm0, %v677_v52 }
 0x7b1   :  { %v639_v56 = vmax.f32 %v636_v2, 0.0  ;;  %v1925_v2 = vld [vmem:[#allocation2 + $0x98] sm:$0xff] }
 0x7b2   :  { %703 = vmatpush.msra.mxu3 %v1923_v55 }
 0x7b3   :  { %v641_v3 = vrot.slane %v639_v56, 4  ;;  %v647_v4 = vrot.slane %v639_v56, 6  ;;  %1550 = vrot.lane.b32.xlu1 %v1549_v57, %s1653_s20 }
 0x7b4   :  { %704 = vmatpush.msra.mxu3 %v1925_v2 }
 0x7b5   :  { %v648_v5 = vsel %vm207_vm8, %v646_v0, %v647_v4  ;;  %v649_v6 = vsel %vm207_vm8, %v647_v4, %v646_v0  ;;  %v643_v7 = vsel %vm568_vm13, %v641_v3, %v640_v58  ;;  %v1898_v8 = vsel %vm568_vm13, %v640_v58, %v641_v3 }
 0x7b6   :  { %656 = vrot.lane.b32.xlu0 %v648_v5, %s1658_s28  ;;  %v650_v9 = vsel %vm207_vm8, 0.0, %v649_v6  ;;  %705 = vmatpush.msra.mxu3 %v1929_v17  ;;  %v644_v57 = vsel %vm568_vm13, 0.0, %v643_v7 }
 0x7b7   :  { %654 = vrot.lane.b32.xlu2 %v650_v9, %s1658_s28 }
 0x7b9   :  { %v828_v10 = vpop.f32.mrf.mxu2 }
 0x7ba   :  { %v834_v12 = vsel %vm32_vm3, -inf, %v828_v10 }
 0x7bb   :  { %v836_v63 = vsel %vm113_vm5, %v834_v12, -inf }
 0x7bf   :  { %664 = vrot.lane.b32.xlu2 %v639_v56, %s1657_s0 }
 0x7c1   :  { %v831_v13 = vpop.f32.mrf.mxu2 }
 0x7c2   :  { %v835_v62 = vsel %vm2118_vm4, -inf, %v831_v13  ;;  %vm680_vm4 = vcmask 244736  }
 0x7c3   :  { %v837_v20 = vsel %vm113_vm5, %v835_v62, -inf }
 0x7c4   :  { %v838_v21 = vmax.f32 %v836_v63, %v837_v20 }
 0x7c6   :  { %v839_v24 = vrot.slane %v838_v21, 4 }
 0x7c8   :  { %v840_v25 = vmax.f32 %v838_v21, %v839_v24 }
 0x7ca   :  { %v841_v26 = vrot.slane %v840_v25, 2 }
 0x7cc   :  { %v842_v27 = vmax.f32 %v840_v25, %v841_v26 }
 0x7ce   :  { %v843_v28 = vrot.slane %v842_v27, 1 }
 0x7d0   :  { %v844_v31 = vmax.f32 %v842_v27, %v843_v28 }
 0x7d2   :  { %v845_v32 = vsub.f32 %v834_v12, %v844_v31  ;;  %v846_v33 = vsub.f32 %v835_v62, %v844_v31  ;;  %v1945_v31 = vld [vmem:[#allocation2 + $0xb8] sm:$0xff] }
 0x7d3   :  { %743 = vmatpush.msra.mxu1 %v1945_v31 }
 0x7d4   :  { %v847_v34 = vmul.f32 1.442695, %v845_v32  ;;  %v849_v35 = vmul.f32 1.442695, %v846_v33 }
 0x7d6   :  { %1593 = vpow2.f32 %v847_v34 }
 0x7d7   :  { %1595 = vpow2.f32 %v849_v35 }
 0x7dc   :  { %v1594_v36 = vpop.eup %1593 }
 0x7dd   :  { %v1596_v37 = vpop.eup %1595  ;;  %v851_v41 = vsel %vm113_vm5, %v1594_v36, 0.0 }
 0x7de   :  { %v852_v42 = vsel %vm113_vm5, %v1596_v37, 0.0 }
 0x7df   :  { %v853_v43 = vadd.f32 %v852_v42, %v851_v41 }
 0x7e0   :  { %538 = vadd.xlane.f32.xlu0 %v537_v44 }
 0x7e1   :  { %v854_v45 = vrot.slane %v853_v43, 4 }
 0x7e3   :  { %v855_v46 = vadd.f32 %v854_v45, %v853_v43 }
 0x7e5   :  { %v856_v47 = vrot.slane %v855_v46, 2 }
 0x7e7   :  { %v857_v49 = vadd.f32 %v856_v47, %v855_v46 }
 0x7e8   :  { %541 = vadd.xlane.f32.xlu2 %v540_v48 }
 0x7e9   :  { %v858_v50 = vrot.slane %v857_v49, 1 }
 0x7eb   :  { %v859_v51 = vadd.f32 %v858_v50, %v857_v49 }
 0x7ed   :  { %1597 = vrcp.f32 %v859_v51 }
 0x7f3   :  { %v1598_v1 = vpop.eup %1597 }
 0x7f4   :  { %v862_v53 = vmul.f32 %v1598_v1, %v1596_v37  ;;  %v1920_v54 = vmul.f32 %v1598_v1, %v1594_v36 }
 0x7f6   :  { %v901_v14 = vsel %vm113_vm5, %v862_v53, 0.0 }
 0x7f7   :  { %902 = vadd.xlane.f32.xlu0 %v901_v14 }
 0x811   :  { %v655_v56 = vpop.permute.xlu2 %654 }
 0x812   :  { %v669_v58 = vsel %vm668_vm14, %v644_v57, %v655_v56 }
 0x819   :  { %v665_v10 = vpop.permute.xlu2 %664 }
 0x81d   :  { %v663_v0 = vpop.permute.xlu1 %662 }
 0x81e   :  { %v672_v3 = vsel %vm671_vm15, %v669_v58, %v663_v0  ;;  %v1566_v58 = vld [vmem:[#allocation2 + $0xb0] ss:$0 sm:$0xff]  ;;  %v961_v0 = vld [vmem:[#allocation2 + $0x20] sm:$0x3] }
 0x81f   :  { %1489 = vmatmul.msk.f32.vlgmr.msra.gmra.mxu3 %vm680_vm4, %v672_v3  ;;  %1504 = vmatpush.msk.msrb.mxu1 %vm262_vm7, %v961_v0 }
 0x821   :  { %987 = vmatpush.msrb.mxu1 %v1736_v59 }
 0x823   :  { %988 = vmatpush.msrb.mxu1 %v1740_v60 }
 0x825   :  { %v1551_v4 = vpop.permute.xlu1 %1550 }
 0x826   :  { %v1552_v5 = vunpack.i.l.bf16 %v1551_v4  ;;  %v1553_v6 = vunpack.i.h.bf16 %v1551_v4  ;;  %v1567_v4 = vld [vmem:[#allocation2 + $0xc0] ss:$0 sm:$0xff] }
 0x828   :  { %889 = vmatpush.msrb.mxu3 %v1552_v5  ;;  %v657_v9 = vpop.permute.xlu0 %656 }
 0x829   :  { %v670_v12 = vsel %vm668_vm14, %v1898_v8, %v657_v9 }
 0x82a   :  { %890 = vmatpush.msrb.mxu3 %v1553_v6  ;;  %v673_v7 = vsel %vm671_vm15, %v670_v12, %v665_v10 }
 0x82b   :  { %1490 = vmatmul.msk.f32.gmra.mxu3 %vm680_vm4, %v673_v7 }
 0x82c   :  { %1133 = vmatpush.msra.mxu3 %v1792_v11 }
 0x833   :  { %1502 = vmatmul.msk.f32.vlgmr.msrb.gmra.mxu3 %vm113_vm5, %v1920_v54 }
 0x83b   :  { %1503 = vmatmul.msk.f32.gmra.mxu3 %vm113_vm5, %v862_v53 }
 0x853   :  { %v539_v13 = vpop.xlane.xlu0 %538 }
 0x85b   :  { %v542_v62 = vpop.xlane.xlu2 %541 }
 0x85c   :  { %v543_v63 = vmax.f32 %v539_v13, %v542_v62 }
 0x85e   :  { %v544_v20 = vrot.slane %v543_v63, 4 }
 0x860   :  { %v545_v21 = vmax.f32 %v543_v63, %v544_v20 }
 0x862   :  { %v546_v24 = vrot.slane %v545_v21, 2 }
 0x864   :  { %v547_v25 = vmax.f32 %v545_v21, %v546_v24 }
 0x866   :  { %v548_v8 = vrot.slane %v547_v25, 1 }
 0x868   :  { %v549_v26 = vmax.f32 %v547_v25, %v548_v8 }
 0x86a   :  { %v550_v27 = vsub.f32 %v539_v13, %v549_v26  ;;  %v551_v28 = vsub.f32 %v542_v62, %v549_v26 }
 0x86c   :  { %v552_v32 = vmul.f32 1.442695, %v550_v27  ;;  %v554_v11 = vmul.f32 1.442695, %v551_v28 }
 0x86e   :  { %1599 = vpow2.f32 %v552_v32 }
 0x86f   :  { %1601 = vpow2.f32 %v554_v11 }
 0x874   :  { %v1600_v33 = vpop.eup %1599 }
 0x875   :  { %v1602_v34 = vpop.eup %1601 }
 0x876   :  { %v556_v35 = vadd.f32 %v1602_v34, %v1600_v33 }
 0x878   :  { %v557_v36 = vrot.slane %v556_v35, 4 }
 0x87a   :  { %v558_v37 = vadd.f32 %v557_v36, %v556_v35 }
 0x87c   :  { %v559_v41 = vrot.slane %v558_v37, 2 }
 0x87e   :  { %v560_v42 = vadd.f32 %v559_v41, %v558_v37  ;;  %v903_v37 = vpop.xlane.xlu0 %902 }
 0x880   :  { %v561_v43 = vrot.slane %v560_v42, 1 }
 0x882   :  { %v562_v44 = vadd.f32 %v561_v43, %v560_v42 }
 0x884   :  { %1603 = vrcp.f32 %v562_v44 }
 0x88a   :  { %v1604_v45 = vpop.eup %1603 }
 0x88b   :  { %v564_v46 = vmul.f32 %v1604_v45, %v1600_v33  ;;  %v565_v49 = vmul.f32 %v1604_v45, %v1602_v34 }
 0x88d   :  { %v715_v47 = vadd.f32 1.0, %v564_v46  ;;  %v716_v50 = vadd.f32 1.0, %v565_v49 }
 0x88f   :  { %v717_v48 = vmul.f32 %v715_v47, %v402_v23  ;;  %v718_v51 = vmul.f32 %v716_v50, %v403_v30  ;;  %v898_v30 = vsel %vm113_vm5, %v1920_v54, 0.0 }
 0x891   :  { %1491 = vmatmul.msk.f32.vlgmr.msra.gmra.mxu1 %vm319_vm11, %v717_v48 }
 0x899   :  { %1492 = vmatmul.msk.f32.gmra.mxu1 %vm319_vm11, %v718_v51 }
 0x8a2   :  { %v707_v52 = vpop.f32.mrf.mxu3 }
 0x8a3   :  { %v708_v3 = vadd.f32 %v1566_v58, %v707_v52 }
 0x8a5   :  { %v713_v6 = vmax.f32 %v708_v3, 0.0 }
 0x8ae   :  { %v710_v1 = vpop.f32.mrf.mxu3 }
 0x8af   :  { %v711_v12 = vadd.f32 %v1566_v58, %v710_v1  ;;  %v1070_v1 = vld [vmem:[#allocation2 + $0x50] sm:$0x3f] }
 0x8b0   :  { %1509 = vmatpush.msk.msra.mxu2 %vm46_vm0, %v1070_v1 }
 0x8b1   :  { %v714_v62 = vmax.f32 %v711_v12, 0.0 }
 0x8b2   :  { %1327 = vmatpush.msrb.mxu2 %v1867_v38 }
 0x8b4   :  { %1328 = vmatpush.msrb.mxu2 %v1869_v39 }
 0x8b6   :  { %v892_v53 = vpop.f32.mrf.mxu3  ;;  %1329 = vmatpush.msrb.mxu2 %v1873_v40 }
 0x8b7   :  { %949 = vrot.lane.b32.xlu1 %v892_v53, %s1654_s21  ;;  %v933_v56 = vrot.slane %v892_v53, 7  ;;  %v927_v25 = vrot.slane %v892_v53, 6 }
 0x8be   :  { %v895_v14 = vpop.f32.mrf.mxu3 }
 0x8bf   :  { %v934_v57 = vrot.slane %v895_v14, 7  ;;  %v928_v24 = vrot.slane %v895_v14, 6 }
 0x8c1   :  { %v936_v22 = vsel %vm219_vm6, %v934_v57, %v933_v56  ;;  %v935_v29 = vsel %vm219_vm6, %v933_v56, %v934_v57  ;;  %v930_v8 = vsel %vm207_vm8, %v928_v24, %v927_v25  ;;  %v929_v33 = vsel %vm207_vm8, %v927_v25, %v928_v24 }
 0x8c2   :  { %v937_v23 = vsel %vm219_vm6, 0.0, %v936_v22  ;;  %v931_v27 = vsel %vm207_vm8, 0.0, %v930_v8 }
 0x8c3   :  { %941 = vrot.lane.b32.xlu1 %v937_v23, %s1655_s22 }
 0x8cb   :  { %943 = vrot.lane.b32.xlu1 %v935_v29, %s1655_s22 }
 0x8d3   :  { %951 = vrot.lane.b32.xlu1 %v895_v14, %s1654_s21 }
 0x8fd   :  { %899 = vadd.xlane.f32.xlu1 %v898_v30 }
 0x90e   :  { %v745_v5 = vpop.f32.mrf.mxu1 }
 0x90f   :  { %v746_v9 = vadd.f32 %v1567_v4, %v745_v5 }
 0x911   :  { %v751_v10 = vadd.f32 %v746_v9, %v713_v6  ;;  %v1568_v6 = vld [vmem:[#allocation2 + $0x28] ss:$0 sm:$0xff] }
 0x913   :  { %v753_v7 = vmax.f32 %v751_v10, 0.0 }
 0x915   :  { %v755_v13 = vsel %vm668_vm14, %v753_v7, 0.0 }
 0x916   :  { %757 = vst [vmem:[%s2117_s2] sm:$0xff] %v755_v13  ;;  %v748_v54 = vpop.f32.mrf.mxu1 }
 0x917   :  { %v749_v63 = vadd.f32 %v1567_v4, %v748_v54 }
 0x919   :  { %v752_v20 = vadd.f32 %v749_v63, %v714_v62 }
 0x91b   :  { %v754_v21 = vmax.f32 %v752_v20, 0.0 }
 0x91d   :  { %v756_v59 = vsel %vm668_vm14, %v754_v21, 0.0 }
 0x91e   :  { %758 = vst [vmem:[%s2117_s2 + $0x8] sm:$0xff] %v756_v59 }
 0x929   :  { %v950_v60 = vpop.permute.xlu1 %949 }
 0x935   :  { %v942_v26 = vpop.permute.xlu1 %941 }
 0x936   :  { %v955_v28 = vsel %vm39_vm1, %v931_v27, %v942_v26 }
 0x937   :  { %v957_v32 = vsel %vm247_vm10, %v955_v28, %v950_v60 }
 0x938   :  { %1505 = vmatmul.msk.f32.vlgmr.msrb.gmra.mxu1 %vm255_vm9, %v957_v32 }
 0x93d   :  { %v944_v11 = vpop.permute.xlu1 %943 }
 0x93e   :  { %v956_v34 = vsel %vm39_vm1, %v929_v33, %v944_v11 }
 0x945   :  { %v952_v35 = vpop.permute.xlu1 %951 }
 0x946   :  { %v958_v36 = vsel %vm247_vm10, %v956_v34, %v952_v35  ;;  %v1570_v35 = vld [vmem:[#allocation2 + $0x48] ss:$0 sm:$0xff] }
 0x947   :  { %1506 = vmatmul.msk.f32.gmra.mxu1 %vm255_vm9, %v958_v36  ;;  %v1569_v36 = vld [vmem:[#allocation2 + $0x58] ss:$0 sm:$0xff] }
 0x970   :  { %v900_v41 = vpop.xlane.xlu1 %899 }
 0x971   :  { %v904_v42 = vmax.f32 %v900_v41, %v903_v37 }
 0x973   :  { %v905_v43 = vrot.slane %v904_v42, 4 }
 0x975   :  { %v906_v44 = vmax.f32 %v904_v42, %v905_v43 }
 0x977   :  { %v907_v45 = vrot.slane %v906_v44, 2 }
 0x979   :  { %v908_v46 = vmax.f32 %v906_v44, %v907_v45 }
 0x97b   :  { %v909_v47 = vrot.slane %v908_v46, 1 }
 0x97d   :  { %v910_v48 = vmax.f32 %v908_v46, %v909_v47 }
 0x97f   :  { %v911_v49 = vsub.f32 %v900_v41, %v910_v48  ;;  %v912_v50 = vsub.f32 %v903_v37, %v910_v48 }
 0x981   :  { %v913_v51 = vmul.f32 1.442695, %v911_v49  ;;  %v915_v52 = vmul.f32 1.442695, %v912_v50 }
 0x983   :  { %1605 = vpow2.f32 %v913_v51 }
 0x984   :  { %1607 = vpow2.f32 %v915_v52 }
 0x989   :  { %v1606_v53 = vpop.eup %1605 }
 0x98a   :  { %v1608_v14 = vpop.eup %1607 }
 0x98b   :  { %v917_v56 = vadd.f32 %v1608_v14, %v1606_v53 }
 0x98d   :  { %v918_v57 = vrot.slane %v917_v56, 4 }
 0x98f   :  { %v919_v22 = vadd.f32 %v918_v57, %v917_v56 }
 0x991   :  { %v920_v23 = vrot.slane %v919_v22, 2 }
 0x993   :  { %v921_v29 = vadd.f32 %v920_v23, %v919_v22 }
 0x995   :  { %v922_v30 = vrot.slane %v921_v29, 1 }
 0x997   :  { %v923_v58 = vadd.f32 %v922_v30, %v921_v29 }
 0x999   :  { %1609 = vrcp.f32 %v923_v58 }
 0x99f   :  { %v1610_v0 = vpop.eup %1609 }
 0x9a0   :  { %v925_v3 = vmul.f32 %v1610_v0, %v1606_v53  ;;  %v926_v38 = vmul.f32 %v1610_v0, %v1608_v14  ;;  %v1571_v53 = vld [vmem:[#allocation2 + $0x68] ss:$0 sm:$0xff] }
 0x9a2   :  { %v1066_v4 = vadd.f32 1.0, %v925_v3  ;;  %v1067_v39 = vadd.f32 1.0, %v926_v38 }
 0x9a4   :  { %v1068_v5 = vmul.f32 %v1839_v19, %v1066_v4  ;;  %v1069_v40 = vmul.f32 %v1846_v61, %v1067_v39 }
 0x9a6   :  { %1510 = vmatmul.msk.f32.vlgmr.msra.gmra.mxu2 %vm39_vm1, %v1068_v5 }
 0x9ae   :  { %1511 = vmatmul.msk.f32.gmra.mxu2 %vm39_vm1, %v1069_v40  ;;  %vm2119_vm1 = vcmp.gt.s32.totalorder %v1702_v16, %v1705_v18 }
 0x9b5   :  { %v990_v9 = vpop.f32.mrf.mxu1 }
 0x9b6   :  { %v991_v10 = vadd.f32 %v1568_v6, %v990_v9 }
 0x9b8   :  { %v996_v12 = vmax.f32 %v991_v10, 0.0 }
 0x9ba   :  { %1020 = vrot.lane.b32.xlu0 %v996_v12, %s1656_s23  ;;  %v998_v62 = vrot.slane %v996_v12, 6  ;;  %v1004_v63 = vrot.slane %v996_v12, 7 }
 0x9c4   :  { %v993_v7 = vpop.f32.mrf.mxu1 }
 0x9c5   :  { %v994_v13 = vadd.f32 %v1568_v6, %v993_v7 }
 0x9c7   :  { %v997_v54 = vmax.f32 %v994_v13, 0.0 }
 0x9c9   :  { %v999_v19 = vrot.slane %v997_v54, 6  ;;  %v1005_v20 = vrot.slane %v997_v54, 7  ;;  %1022 = vrot.lane.b32.xlu0 %v997_v54, %s1656_s23 }
 0x9cb   :  { %v1007_v61 = vsel %vm219_vm6, %v1005_v20, %v1004_v63  ;;  %v1001_v21 = vsel %vm207_vm8, %v999_v19, %v998_v62  ;;  %v1000_v59 = vsel %vm207_vm8, %v998_v62, %v999_v19  ;;  %v1006_v24 = vsel %vm219_vm6, %v1004_v63, %v1005_v20 }
 0x9cc   :  { %v1008_v60 = vsel %vm219_vm6, 0.0, %v1007_v61  ;;  %v1002_v8 = vsel %vm207_vm8, 0.0, %v1001_v21 }
 0x9cd   :  { %1012 = vrot.lane.b32.xlu2 %v1008_v60, %s1651_s15 }
 0x9d5   :  { %1014 = vrot.lane.b32.xlu2 %v1006_v24, %s1651_s15 }
 0xa27   :  { %v1013_v25 = vpop.permute.xlu2 %1012 }
 0xa28   :  { %v1026_v26 = vsel %vm319_vm11, %v1002_v8, %v1013_v25 }
 0xa29   :  { %v1099_v37 = vpop.f32.mrf.mxu2 }
 0xa2a   :  { %v1100_v43 = vadd.f32 %v1569_v36, %v1099_v37 }
 0xa2c   :  { %v1021_v27 = vpop.permute.xlu0 %1020 }
 0xa2d   :  { %v1028_v28 = vsel %vm113_vm5, %v1026_v26, %v1021_v27 }
 0xa2e   :  { %1507 = vmatmul.msk.f32.vlgmr.msra.gmra.mxu0 %vm329_vm12, %v1028_v28 }
 0xa2f   :  { %v1015_v32 = vpop.permute.xlu2 %1014 }
 0xa30   :  { %v1027_v11 = vsel %vm319_vm11, %v1000_v59, %v1015_v32 }
 0xa31   :  { %v1102_v47 = vpop.f32.mrf.mxu2 }
 0xa32   :  { %v1103_v50 = vadd.f32 %v1569_v36, %v1102_v47 }
 0xa3b   :  { %v1023_v33 = vpop.permute.xlu0 %1022 }
 0xa3c   :  { %v1029_v34 = vsel %vm113_vm5, %v1027_v11, %v1023_v33 }
 0xa3d   :  { %1508 = vmatmul.msk.f32.gmra.mxu0 %vm329_vm12, %v1029_v34 }
 0xaab   :  { %v1058_v41 = vpop.f32.mrf.mxu0 }
 0xaac   :  { %v1059_v42 = vadd.f32 %v1570_v35, %v1058_v41 }
 0xaae   :  { %v1064_v44 = vmax.f32 %v1059_v42, 0.0 }
 0xab0   :  { %v2019_v45 = vadd.f32 %v1100_v43, %v1064_v44 }
 0xab2   :  { %v1107_v46 = vmax.f32 %v2019_v45, 0.0 }
 0xab4   :  { %1512 = vmatmul.msk.f32.vlgmr.msra.gmra.mxu3 %vm319_vm11, %v1107_v46 }
 0xaba   :  { %v1061_v48 = vpop.f32.mrf.mxu0 }
 0xabb   :  { %v1062_v49 = vadd.f32 %v1570_v35, %v1061_v48 }
 0xabd   :  { %v1065_v51 = vmax.f32 %v1062_v49, 0.0 }
 0xabf   :  { %v2025_v52 = vadd.f32 %v1103_v50, %v1065_v51 }
 0xac1   :  { %v1108_v1 = vmax.f32 %v2025_v52, 0.0 }
 0xac3   :  { %1513 = vmatmul.msk.f32.gmra.mxu3 %vm319_vm11, %v1108_v1 }
 0xb37   :  { %v1135_v14 = vpop.f32.mrf.mxu3 }
 0xb38   :  { %v1136_v56 = vadd.f32 %v1571_v53, %v1135_v14 }
 0xb3a   :  { %1143 = vrot.lane.b32.xlu1 %v1136_v56, %s1652_s19 }
 0xb46   :  { %v1138_v57 = vpop.f32.mrf.mxu3 }
 0xb47   :  { %v1139_v22 = vadd.f32 %v1571_v53, %v1138_v57 }
 0xb49   :  { %1145 = vrot.lane.b32.xlu2 %v1139_v22, %s1652_s19  ;;  %v1554_v23 = vpack.i.bf16 %v1136_v56, %v1139_v22 }
 0xb4b   :  { %1555 = vrot.lane.b32.xlu0 %v1554_v23, %s1653_s20 }
 0xba3   :  { %v1146_v29 = vpop.permute.xlu2 %1145 }
 0xba4   :  { %1514 = vmatpush.xpose.msk.msra.mxu1 %vm79_vm2, %v1146_v29 }
 0xbac   :  { %v1144_v30 = vpop.permute.xlu1 %1143 }
 0xbad   :  { %1515 = vmatpush.xpose.msk.msra.mxu1 %vm79_vm2, %v1144_v30 }
 0xbb0   :  { %1516 = vmatmul.msk.f32.vlgmr.msra.gmra.mxu1 %vm79_vm2, %v1136_v56 }
 0xbb1   :  { %1439 = vmatpush.msrb.mxu1 %v1945_v31 }
 0xbb8   :  { %1517 = vmatmul.msk.f32.gmra.mxu1 %vm79_vm2, %v1139_v22 }
 0xbbd   :  { %v1556_v58 = vpop.permute.xlu0 %1555 }
 0xbbe   :  { %v1557_v0 = vunpack.i.l.bf16 %v1556_v58  ;;  %v1558_v3 = vunpack.i.h.bf16 %v1556_v58 }
 0xbc0   :  { %1233 = vmatpush.msrb.mxu0 %v1557_v0 }
 0xbc2   :  { %1234 = vmatpush.msrb.mxu0 %v1558_v3 }
 0xc2d   :  { %v1172_v4 = vpop.f32.mrf.mxu1 }
 0xc2e   :  { %v1178_v5 = vsel %vm32_vm3, -inf, %v1172_v4 }
 0xc2f   :  { %v1180_v31 = vsel %vm113_vm5, %v1178_v5, -inf }
 0xc35   :  { %v1175_v38 = vpop.f32.mrf.mxu1 }
 0xc36   :  { %v1179_v39 = vsel %vm2119_vm1, -inf, %v1175_v38 }
 0xc37   :  { %v1181_v40 = vsel %vm113_vm5, %v1179_v39, -inf }
 0xc38   :  { %v1182_v6 = vmax.f32 %v1180_v31, %v1181_v40 }
 0xc3a   :  { %v1183_v9 = vrot.slane %v1182_v6, 4 }
 0xc3c   :  { %v1184_v10 = vmax.f32 %v1182_v6, %v1183_v9 }
 0xc3e   :  { %v1185_v12 = vrot.slane %v1184_v10, 2 }
 0xc40   :  { %v1186_v7 = vmax.f32 %v1184_v10, %v1185_v12 }
 0xc42   :  { %v1187_v13 = vrot.slane %v1186_v7, 1 }
 0xc44   :  { %v1188_v54 = vmax.f32 %v1186_v7, %v1187_v13 }
 0xc46   :  { %v1189_v62 = vsub.f32 %v1178_v5, %v1188_v54  ;;  %v1190_v63 = vsub.f32 %v1179_v39, %v1188_v54 }
 0xc48   :  { %v1191_v19 = vmul.f32 1.442695, %v1189_v62  ;;  %v1193_v20 = vmul.f32 1.442695, %v1190_v63 }
 0xc4a   :  { %1611 = vpow2.f32 %v1191_v19 }
 0xc4b   :  { %1613 = vpow2.f32 %v1193_v20 }
 0xc50   :  { %v1612_v61 = vpop.eup %1611 }
 0xc51   :  { %v1614_v16 = vpop.eup %1613  ;;  %v1195_v18 = vsel %vm113_vm5, %v1612_v61, 0.0 }
 0xc52   :  { %v1196_v21 = vsel %vm113_vm5, %v1614_v16, 0.0 }
 0xc53   :  { %v1197_v59 = vadd.f32 %v1196_v21, %v1195_v18 }
 0xc55   :  { %v1198_v60 = vrot.slane %v1197_v59, 4 }
 0xc57   :  { %v1199_v24 = vadd.f32 %v1198_v60, %v1197_v59 }
 0xc59   :  { %v1200_v25 = vrot.slane %v1199_v24, 2 }
 0xc5b   :  { %v1201_v8 = vadd.f32 %v1200_v25, %v1199_v24 }
 0xc5d   :  { %v1202_v26 = vrot.slane %v1201_v8, 1 }
 0xc5f   :  { %v1203_v27 = vadd.f32 %v1202_v26, %v1201_v8  ;;  %v1572_v26 = vld [vmem:[#allocation2 + $0x88] ss:$0 sm:$0xff] }
 0xc61   :  { %1615 = vrcp.f32 %v1203_v27 }
 0xc67   :  { %v1616_v28 = vpop.eup %1615 }
 0xc68   :  { %v1205_v32 = vmul.f32 %v1616_v28, %v1612_v61  ;;  %v1206_v11 = vmul.f32 %v1616_v28, %v1614_v16 }
 0xc6a   :  { %1518 = vmatmul.msk.f32.vlgmr.msrb.gmra.mxu0 %vm113_vm5, %v1205_v32  ;;  %v1245_v49 = vsel %vm113_vm5, %v1206_v11, 0.0  ;;  %v1242_v50 = vsel %vm113_vm5, %v1205_v32, 0.0 }
 0xc72   :  { %1519 = vmatmul.msk.f32.gmra.mxu0 %vm113_vm5, %v1206_v11 }
 0xce7   :  { %v1236_v33 = vpop.f32.mrf.mxu0 }
 0xce8   :  { %1293 = vrot.lane.b32.xlu0 %v1236_v33, %s1656_s23  ;;  %v1271_v35 = vrot.slane %v1236_v33, 4  ;;  %v1277_v36 = vrot.slane %v1236_v33, 6 }
 0xcef   :  { %v1239_v34 = vpop.f32.mrf.mxu0 }
 0xcf0   :  { %v1272_v37 = vrot.slane %v1239_v34, 4  ;;  %v1278_v41 = vrot.slane %v1239_v34, 6  ;;  %1295 = vrot.lane.b32.xlu0 %v1239_v34, %s1656_s23 }
 0xcf2   :  { %v1280_v42 = vsel %vm207_vm8, %v1278_v41, %v1277_v36  ;;  %v1274_v43 = vsel %vm568_vm13, %v1272_v37, %v1271_v35  ;;  %v1273_v44 = vsel %vm568_vm13, %v1271_v35, %v1272_v37  ;;  %v1279_v48 = vsel %vm207_vm8, %v1277_v36, %v1278_v41 }
 0xcf3   :  { %v1281_v47 = vsel %vm207_vm8, 0.0, %v1280_v42  ;;  %v1275_v53 = vsel %vm568_vm13, 0.0, %v1274_v43  ;;  %v1374_v43 = vld [vmem:[#allocation2 + $0xa8] sm:$0x3f] }
 0xcf4   :  { %1285 = vrot.lane.b32.xlu2 %v1281_v47, %s1651_s15  ;;  %1522 = vmatpush.msk.msrb.mxu3 %vm46_vm0, %v1374_v43 }
 0xcf6   :  { %1399 = vmatpush.msrb.mxu3 %v1923_v55 }
 0xcf8   :  { %1400 = vmatpush.msrb.mxu3 %v1925_v2  ;;  %v1574_v2 = vld [vmem:[#allocation2 + $0xb0] ss:$0 sm:$0xff] }
 0xcfa   :  { %1401 = vmatpush.msrb.mxu3 %v1929_v17  ;;  %v1573_v17 = vld [vmem:[#allocation2 + $0xc0] ss:$0 sm:$0xff] }
 0xcfc   :  { %1287 = vrot.lane.b32.xlu2 %v1279_v48, %s1651_s15 }
 0xd1a   :  { %1246 = vadd.xlane.f32.xlu0 %v1245_v49 }
 0xd25   :  { %1243 = vadd.xlane.f32.xlu2 %v1242_v50 }
 0xd4e   :  { %v1286_v51 = vpop.permute.xlu2 %1285 }
 0xd4f   :  { %v1299_v14 = vsel %vm319_vm11, %v1275_v53, %v1286_v51 }
 0xd56   :  { %v1288_v22 = vpop.permute.xlu2 %1287 }
 0xd57   :  { %v1300_v23 = vsel %vm319_vm11, %v1273_v44, %v1288_v22 }
 0xd5a   :  { %v1294_v56 = vpop.permute.xlu0 %1293 }
 0xd5b   :  { %v1301_v57 = vsel %vm113_vm5, %v1299_v14, %v1294_v56 }
 0xd5c   :  { %1520 = vmatmul.msk.f32.vlgmr.msrb.gmra.mxu2 %vm329_vm12, %v1301_v57 }
 0xd62   :  { %v1296_v29 = vpop.permute.xlu0 %1295 }
 0xd63   :  { %v1302_v30 = vsel %vm113_vm5, %v1300_v23, %v1296_v29 }
 0xd64   :  { %1521 = vmatmul.msk.f32.gmra.mxu2 %vm329_vm12, %v1302_v30 }
 0xd8d   :  { %v1247_v58 = vpop.xlane.xlu0 %1246 }
 0xd98   :  { %v1244_v0 = vpop.xlane.xlu2 %1243 }
 0xd99   :  { %v1248_v3 = vmax.f32 %v1244_v0, %v1247_v58 }
 0xd9b   :  { %v1249_v4 = vrot.slane %v1248_v3, 4 }
 0xd9d   :  { %v1250_v5 = vmax.f32 %v1248_v3, %v1249_v4 }
 0xd9f   :  { %v1251_v38 = vrot.slane %v1250_v5, 2 }
 0xda1   :  { %v1252_v39 = vmax.f32 %v1250_v5, %v1251_v38 }
 0xda3   :  { %v1253_v31 = vrot.slane %v1252_v39, 1 }
 0xda5   :  { %v1254_v40 = vmax.f32 %v1252_v39, %v1253_v31 }
 0xda7   :  { %v1255_v6 = vsub.f32 %v1244_v0, %v1254_v40  ;;  %v1256_v9 = vsub.f32 %v1247_v58, %v1254_v40 }
 0xda9   :  { %v1257_v10 = vmul.f32 1.442695, %v1255_v6  ;;  %v1259_v12 = vmul.f32 1.442695, %v1256_v9 }
 0xdab   :  { %1617 = vpow2.f32 %v1257_v10 }
 0xdac   :  { %1619 = vpow2.f32 %v1259_v12 }
 0xdb1   :  { %v1618_v7 = vpop.eup %1617 }
 0xdb2   :  { %v1620_v13 = vpop.eup %1619 }
 0xdb3   :  { %v1261_v54 = vadd.f32 %v1620_v13, %v1618_v7 }
 0xdb5   :  { %v1262_v62 = vrot.slane %v1261_v54, 4 }
 0xdb7   :  { %v1263_v63 = vadd.f32 %v1262_v62, %v1261_v54 }
 0xdb9   :  { %v1264_v19 = vrot.slane %v1263_v63, 2 }
 0xdbb   :  { %v1265_v20 = vadd.f32 %v1264_v19, %v1263_v63 }
 0xdbd   :  { %v1266_v61 = vrot.slane %v1265_v20, 1 }
 0xdbf   :  { %v1267_v16 = vadd.f32 %v1266_v61, %v1265_v20 }
 0xdc1   :  { %1621 = vrcp.f32 %v1267_v16 }
 0xdc7   :  { %v1622_v18 = vpop.eup %1621 }
 0xdc8   :  { %v1269_v21 = vmul.f32 %v1622_v18, %v1618_v7  ;;  %v1270_v24 = vmul.f32 %v1622_v18, %v1620_v13 }
 0xdca   :  { %v1411_v59 = vadd.f32 1.0, %v1269_v21  ;;  %v1412_v25 = vadd.f32 1.0, %v1270_v24 }
 0xdcc   :  { %v1413_v60 = vmul.f32 %v1411_v59, %v1107_v46  ;;  %v1414_v8 = vmul.f32 %v1412_v25, %v1108_v1 }
 0xdce   :  { %1525 = vmatmul.msk.f32.vlgmr.msrb.gmra.mxu1 %vm319_vm11, %v1413_v60 }
 0xdd6   :  { %1526 = vmatmul.msk.f32.gmra.mxu1 %vm319_vm11, %v1414_v8 }
 0xddf   :  { %v1331_v27 = vpop.f32.mrf.mxu2 }
 0xde0   :  { %v1332_v28 = vadd.f32 %v1572_v26, %v1331_v27 }
 0xde2   :  { %v1337_v32 = vmax.f32 %v1332_v28, 0.0 }
 0xde4   :  { %1361 = vrot.lane.b32.xlu1 %v1337_v32, %s1657_s0  ;;  %v1339_v45 = vrot.slane %v1337_v32, 4  ;;  %v1345_v46 = vrot.slane %v1337_v32, 6 }
 0xde7   :  { %v1334_v11 = vpop.f32.mrf.mxu2 }
 0xde8   :  { %v1335_v33 = vadd.f32 %v1572_v26, %v1334_v11 }
 0xdea   :  { %v1338_v34 = vmax.f32 %v1335_v33, 0.0 }
 0xdec   :  { %v1340_v35 = vrot.slane %v1338_v34, 4  ;;  %v1346_v36 = vrot.slane %v1338_v34, 6 }
 0xdee   :  { %v1348_v37 = vsel %vm207_vm8, %v1346_v36, %v1345_v46  ;;  %v1342_v52 = vsel %vm568_vm13, %v1340_v35, %v1339_v45  ;;  %v1341_v1 = vsel %vm568_vm13, %v1339_v45, %v1340_v35  ;;  %v1347_v42 = vsel %vm207_vm8, %v1345_v46, %v1346_v36 }
 0xdef   :  { %v1349_v41 = vsel %vm207_vm8, 0.0, %v1348_v37  ;;  %v1343_v48 = vsel %vm568_vm13, 0.0, %v1342_v52 }
 0xdf0   :  { %1353 = vrot.lane.b32.xlu1 %v1349_v41, %s1658_s28 }
 0xdf8   :  { %1355 = vrot.lane.b32.xlu1 %v1347_v42, %s1658_s28 }
 0xe00   :  { %1363 = vrot.lane.b32.xlu1 %v1338_v34, %s1657_s0 }
 0xe4b   :  { %v1441_v56 = vpop.f32.mrf.mxu1 }
 0xe4c   :  { %v1442_v22 = vadd.f32 %v1573_v17, %v1441_v56 }
 0xe53   :  { %v1444_v0 = vpop.f32.mrf.mxu1 }
 0xe54   :  { %v1445_v5 = vadd.f32 %v1573_v17, %v1444_v0 }
 0xe56   :  { %v1362_v44 = vpop.permute.xlu1 %1361 }
 0xe62   :  { %v1354_v47 = vpop.permute.xlu1 %1353 }
 0xe63   :  { %v1367_v49 = vsel %vm668_vm14, %v1343_v48, %v1354_v47 }
 0xe64   :  { %v1369_v50 = vsel %vm671_vm15, %v1367_v49, %v1362_v44 }
 0xe65   :  { %1523 = vmatmul.msk.f32.vlgmr.msrb.gmra.mxu3 %vm680_vm4, %v1369_v50 }
 0xe6a   :  { %v1356_v51 = vpop.permute.xlu1 %1355 }
 0xe6b   :  { %v1368_v53 = vsel %vm668_vm14, %v1341_v1, %v1356_v51 }
 0xe72   :  { %v1364_v14 = vpop.permute.xlu1 %1363 }
 0xe73   :  { %v1370_v55 = vsel %vm671_vm15, %v1368_v53, %v1364_v14 }
 0xe74   :  { %1524 = vmatmul.msk.f32.gmra.mxu3 %vm680_vm4, %v1370_v55 }
 0xee8   :  { %v1403_v57 = vpop.f32.mrf.mxu3 }
 0xee9   :  { %v1404_v15 = vadd.f32 %v1574_v2, %v1403_v57 }
 0xeeb   :  { %v1409_v23 = vmax.f32 %v1404_v15, 0.0 }
 0xeed   :  { %v1447_v29 = vadd.f32 %v1442_v22, %v1409_v23 }
 0xeef   :  { %v1449_v30 = vmax.f32 %v1447_v29, 0.0 }
 0xef1   :  { %v1451_v58 = vsel %vm668_vm14, %v1449_v30, 0.0 }
 0xef2   :  { %1527 = vst [vmem:[%s2117_s2 + $0x10] sm:$0xff] %v1451_v58 }
 0xef7   :  { %v1406_v3 = vpop.f32.mrf.mxu3 }
 0xef8   :  { %v1407_v4 = vadd.f32 %v1574_v2, %v1406_v3 }
 0xefa   :  { %v1410_v38 = vmax.f32 %v1407_v4, 0.0 }
 0xefc   :  { %v1448_v39 = vadd.f32 %v1445_v5, %v1410_v38 }
 0xefe   :  { %v1450_v31 = vmax.f32 %v1448_v39, 0.0 }
 0xf00   :  { %v1452_v40 = vsel %vm668_vm14, %v1450_v31, 0.0 }
 0xf01   :  { %1528 = vst [vmem:[%s2117_s2 + $0x18] sm:$0xff] %v1452_v40 }
 0xf02   :  { %1460 = vsyncpa [#allocation3], 1 }

</bundles_post_ra>
